<compile_context>
chip_gen: v7x
topology: tpu7x:2x2x1
jax: 0.10.0
libtpu: 0.0.40
codegen_flags: <defaults>
</compile_context>

<pallas_src>
import functools

import numpy as np
import jax
import jax.numpy as jnp
from jax.experimental import pallas as pl
from jax.experimental.pallas import tpu as pltpu

BN_EPS = 1e-5
LANE = 128
VMEM_LIMIT = 32 * 1024 * 1024  # safe on v5e/v6e/v7x; far above this kernel's need


def _rup(x, m=LANE):
    return ((x + m - 1) // m) * m


def _interp_matrix(n_in, n_out):
    """PyTorch bilinear align_corners=True 1-D interpolation matrix (n_out, n_in)."""
    A = np.zeros((n_out, n_in), np.float32)
    if n_in == 1:
        A[:, 0] = 1.0
        return A
    for i in range(n_out):
        src = i * (n_in - 1) / (n_out - 1) if n_out > 1 else 0.0
        i0 = min(int(np.floor(src)), n_in - 2)
        f = src - i0
        A[i, i0] += 1.0 - f
        A[i, i0 + 1] += f
    return A


def _pick_row_tile(h):
    for th in (32, 16, 8, 4, 2):
        if th < h and h % th == 0:
            return th
    return h


# ---------------------------------------------------------------------------
# Kernel 1: separable bilinear upsample of x1 + F.pad + channel-concat with x2,
# written directly as the zero-halo'd conv1 input (bf16).  grid = (N,)
# ---------------------------------------------------------------------------
def _upsample_pack_kernel(pad_top, pad_left, x1_ref, x2_ref, rw_ref, rh_ref,
                          xcat_ref):
    _, W1, H1, C1 = x1_ref.shape          # x1 arrives in (W, H, C) layout
    _, H2, W2, C2 = x2_ref.shape
    Wu = rw_ref.shape[0]
    Hu = rh_ref.shape[0]
    CIN = xcat_ref.shape[-1]
    cdt = xcat_ref.dtype

    # zero only the 1-pixel conv halo ring (not the whole buffer)
    xcat_ref[:, 0:1, :, :] = jnp.zeros((1, 1, W2 + 2, CIN), cdt)
    xcat_ref[:, H2 + 1:H2 + 2, :, :] = jnp.zeros((1, 1, W2 + 2, CIN), cdt)
    xcat_ref[:, 1:H2 + 1, 0:1, :] = jnp.zeros((1, H2, 1, CIN), cdt)
    xcat_ref[:, 1:H2 + 1, W2 + 1:W2 + 2, :] = jnp.zeros((1, H2, 1, CIN), cdt)

    # x2 -> first C2 channels (torch.cat([x2, x1], dim=1) order)
    xcat_ref[:, 1:H2 + 1, 1:W2 + 1, 0:C2] = x2_ref[...].astype(cdt)

    # separable bilinear upsample: two bf16 MXU matmuls, f32 accumulation.
    # x1 is given W-major so both contractions are plain leading-dim 2-D dots;
    # a single leading-dims swap (minor/lane dim untouched) turns the corner.
    a = x1_ref[0].astype(jnp.bfloat16).reshape(W1, H1 * C1)
    b = jnp.dot(rw_ref[...], a, preferred_element_type=jnp.float32)   # (Wu, H1*C1)
    b = jnp.transpose(b.reshape(Wu, H1, C1), (1, 0, 2))               # (H1, Wu, C1)
    c = jnp.dot(rh_ref[...], b.astype(jnp.bfloat16).reshape(H1, Wu * C1),
                preferred_element_type=jnp.float32)                   # (Hu, Wu*C1)
    up = c.reshape(Hu, Wu, C1)

    # F.pad border inside the up(x1) channel slice (emitted only when needed)
    pad_bottom = H2 - Hu - pad_top
    pad_right = W2 - Wu - pad_left
    cup = CIN - C2
    if pad_top > 0:
        xcat_ref[:, 1:1 + pad_top, 1:W2 + 1, C2:CIN] = \
            jnp.zeros((1, pad_top, W2, cup), cdt)
    if pad_bottom > 0:
        xcat_ref[:, 1 + pad_top + Hu:1 + H2, 1:W2 + 1, C2:CIN] = \
            jnp.zeros((1, pad_bottom, W2, cup), cdt)
    if pad_left > 0:
        xcat_ref[:, 1 + pad_top:1 + pad_top + Hu, 1:1 + pad_left, C2:CIN] = \
            jnp.zeros((1, Hu, pad_left, cup), cdt)
    if pad_right > 0:
        xcat_ref[:, 1 + pad_top:1 + pad_top + Hu, 1 + pad_left + Wu:1 + W2, C2:CIN] = \
            jnp.zeros((1, Hu, pad_right, cup), cdt)

    xcat_ref[:, 1 + pad_top:1 + pad_top + Hu,
             1 + pad_left:1 + pad_left + Wu, C2:CIN] = \
        up.astype(cdt).reshape(1, Hu, Wu, C1)
    # TODO(synk): at very large H2/W2 this per-image step should also be row-tiled.


# ---------------------------------------------------------------------------
# Kernel 2: conv1 (one im2col matmul, K = 9*(C1+C2)) + per-tile BN1 partials.
# grid = (N, H2//TH); halo rows come from a second 2-row BlockSpec on xcat.
# ---------------------------------------------------------------------------
def _conv1_kernel(x_ref, xh_ref, w_ref, a_ref, st_ref, slab_ref, col_ref):
    _, TH, WP, CIN = x_ref.shape
    W2 = WP - 2
    CP = w_ref.shape[1]

    # (TH+2)-row halo slab: main rows + 2 trailing halo rows (xcat is pre-padded)
    slab_ref[0:TH] = x_ref[0]
    slab_ref[TH:TH + 2] = xh_ref[0]

    # im2col taps written into a persistent VMEM scratch (no concat copies)
    for k in range(9):
        dy, dx = k // 3, k % 3
        col_ref[:, k * CIN:(k + 1) * CIN] = \
            slab_ref[dy:dy + TH, dx:dx + W2, :].reshape(TH * W2, CIN)

    acc = jnp.dot(col_ref[...], w_ref[...], preferred_element_type=jnp.float32)

    # per-tile BatchNorm partial stats: mean and centered sum-of-squares (f32)
    inv = 1.0 / float(TH * W2)
    mu = jnp.sum(acc, axis=0, keepdims=True) * inv
    d = acc - mu
    m2 = jnp.sum(d * d, axis=0, keepdims=True)
    st_ref[:, :, 0:1, :] = mu.reshape(1, 1, 1, CP)
    st_ref[:, :, 1:2, :] = m2.reshape(1, 1, 1, CP)

    a_ref[...] = acc.reshape(1, TH, W2, CP)


# ---------------------------------------------------------------------------
# Kernel 3: BN1(global stats)+ReLU -> conv2 (im2col matmul) + per-tile BN2
# partials.  Halo rows of the pre-BN activation come from 1-row BlockSpecs
# (clamped at the image border and zeroed with pl.when).
# ---------------------------------------------------------------------------
def _bn_conv2_kernel(a_ref, at_ref, ab_ref, s_ref, b_ref, w_ref,
                     o_ref, st_ref, slab_ref, col_ref):
    t = pl.program_id(1)
    t_last = pl.num_programs(1) - 1
    _, TH, W2, CM = a_ref.shape
    CP = w_ref.shape[1]
    sdt = slab_ref.dtype

    scale = s_ref[...]           # (1, CM) f32
    shift = b_ref[...]

    def h(x2d):                  # training-mode BN1 + ReLU, f32 math -> bf16
        return jnp.maximum(x2d * scale + shift, 0.0).astype(sdt)

    # zero the W halo columns of the slab (covers the corner rows too)
    zc = jnp.zeros((TH + 2, 1, CM), sdt)
    slab_ref[:, 0:1, :] = zc
    slab_ref[:, W2 + 1:W2 + 2, :] = zc

    # interior rows
    slab_ref[1:TH + 1, 1:W2 + 1, :] = \
        h(a_ref[0].reshape(TH * W2, CM)).reshape(TH, W2, CM)

    # top / bottom 1-row halos (zero outside the image)
    zr = jnp.zeros((1, W2, CM), sdt)

    @pl.when(t == 0)
    def _():
        slab_ref[0:1, 1:W2 + 1, :] = zr

    @pl.when(t > 0)
    def _():
        slab_ref[0:1, 1:W2 + 1, :] = h(at_ref[0].reshape(W2, CM)).reshape(1, W2, CM)

    @pl.when(t == t_last)
    def _():
        slab_ref[TH + 1:TH + 2, 1:W2 + 1, :] = zr

    @pl.when(t < t_last)
    def _():
        slab_ref[TH + 1:TH + 2, 1:W2 + 1, :] = \
            h(ab_ref[0].reshape(W2, CM)).reshape(1, W2, CM)

    for k in range(9):
        dy, dx = k // 3, k % 3
        col_ref[:, k * CM:(k + 1) * CM] = \
            slab_ref[dy:dy + TH, dx:dx + W2, :].reshape(TH * W2, CM)

    acc = jnp.dot(col_ref[...], w_ref[...], preferred_element_type=jnp.float32)

    inv = 1.0 / float(TH * W2)
    mu = jnp.sum(acc, axis=0, keepdims=True) * inv
    d = acc - mu
    m2 = jnp.sum(d * d, axis=0, keepdims=True)
    st_ref[:, :, 0:1, :] = mu.reshape(1, 1, 1, CP)
    st_ref[:, :, 1:2, :] = m2.reshape(1, 1, 1, CP)

    o_ref[...] = acc.reshape(1, TH, W2, CP)


# ---------------------------------------------------------------------------
# Kernel 4: BN2(global stats) + ReLU, lane-dense (channels padded to 128).
# ---------------------------------------------------------------------------
def _bn_relu_kernel(a_ref, s_ref, b_ref, y_ref):
    _, TH, W2, CP = a_ref.shape
    x = a_ref[0].reshape(TH * W2, CP)
    y = jnp.maximum(x * s_ref[...] + b_ref[...], 0.0)
    y_ref[...] = y.reshape(1, TH, W2, CP).astype(y_ref.dtype)


# ---------------------------------------------------------------------------
# Wrapper
# ---------------------------------------------------------------------------
def _bn_affine(stats, gamma, beta, rows_per_tile):
    """Exact (Chan) combination of per-tile (mean, M2) -> BN scale/shift."""
    mu_t = stats[:, :, 0, :]
    m2_t = stats[:, :, 1, :]
    n_tiles = mu_t.shape[0] * mu_t.shape[1]
    total = n_tiles * rows_per_tile
    mu = jnp.mean(mu_t, axis=(0, 1))                       # equal tile counts
    m2 = jnp.sum(m2_t, axis=(0, 1)) + \
         rows_per_tile * jnp.sum((mu_t - mu) ** 2, axis=(0, 1))
    var = m2 / total                                       # biased, as in training BN
    scale = gamma * jax.lax.rsqrt(var + BN_EPS)
    shift = beta - mu * scale
    return scale.reshape(1, -1), shift.reshape(1, -1)


def up_forward(params, x1_nchw, x2_nchw):
    """Up.forward(x1, x2) with bilinear=True (the module default).  NCHW in/out."""
    # TODO(synk): the bilinear=False ConvTranspose2d branch is not implemented.
    # TODO(synk): the original code calls `torch.func.pad` (invalid); the evident
    # intent (torch.nn.functional.pad to x2's spatial size) is implemented.
    N, C1, H1, W1 = x1_nchw.shape
    N2, C2, H2, W2 = x2_nchw.shape
    assert N == N2 and H2 % 2 == 0
    Hu, Wu = 2 * H1, 2 * W1
    assert Hu <= H2 and Wu <= W2
    pad_top, pad_left = (H2 - Hu) // 2, (W2 - Wu) // 2

    CIN = C1 + C2
    CMP = params["w1"].shape[1]            # hidden channels padded to 128 lanes
    COP = params["w2"].shape[1]            # output channels padded to 128 lanes
    Cout = params["cout"]
    assert params["w1"].shape[0] == 9 * CIN

    TH = _pick_row_tile(H2)
    nTH = H2 // TH

    x1_whc = jnp.transpose(x1_nchw, (0, 3, 2, 1)).astype(jnp.float32)   # (N,W1,H1,C1)
    x2 = jnp.transpose(x2_nchw, (0, 2, 3, 1)).astype(jnp.float32)       # NHWC

    rw = jnp.asarray(_interp_matrix(W1, Wu), jnp.bfloat16)
    rh = jnp.asarray(_interp_matrix(H1, Hu), jnp.bfloat16)

    def cp(sem):
        return pltpu.CompilerParams(dimension_semantics=sem,
                                    vmem_limit_bytes=VMEM_LIMIT)

    # ---- kernel 1: upsample + pad + channel-concat -> zero-halo'd conv1 input
    xcat = pl.pallas_call(
        functools.partial(_upsample_pack_kernel, pad_top, pad_left),
        out_shape=jax.ShapeDtypeStruct((N, H2 + 2, W2 + 2, CIN), jnp.bfloat16),
        grid=(N,),
        in_specs=[
            pl.BlockSpec((1, W1, H1, C1), lambda n: (n, 0, 0, 0)),
            pl.BlockSpec((1, H2, W2, C2), lambda n: (n, 0, 0, 0)),
            pl.BlockSpec((Wu, W1), lambda n: (0, 0)),
            pl.BlockSpec((Hu, H1), lambda n: (0, 0)),
        ],
        out_specs=pl.BlockSpec((1, H2 + 2, W2 + 2, CIN), lambda n: (n, 0, 0, 0)),
        compiler_params=cp(("parallel",)),
    )(x1_whc, x2, rw, rh)

    # ---- kernel 2: conv1 + per-tile BN1 partial stats -------------------------
    a1, st1 = pl.pallas_call(
        _conv1_kernel,
        out_shape=(jax.ShapeDtypeStruct((N, H2, W2, CMP), jnp.float32),
                   jax.ShapeDtypeStruct((N, nTH, 2, CMP), jnp.float32)),
        grid=(N, nTH),
        in_specs=[
            pl.BlockSpec((1, TH, W2 + 2, CIN), lambda n, t: (n, t, 0, 0)),
            pl.BlockSpec((1, 2, W2 + 2, CIN),
                         lambda n, t: (n, (t + 1) * (TH // 2), 0, 0)),
            pl.BlockSpec((9 * CIN, CMP), lambda n, t: (0, 0)),
        ],
        out_specs=(pl.BlockSpec((1, TH, W2, CMP), lambda n, t: (n, t, 0, 0)),
                   pl.BlockSpec((1, 1, 2, CMP), lambda n, t: (n, t, 0, 0))),
        scratch_shapes=[pltpu.VMEM((TH + 2, W2 + 2, CIN), jnp.bfloat16),
                        pltpu.VMEM((TH * W2, 9 * CIN), jnp.bfloat16)],
        compiler_params=cp(("parallel", "parallel")),
    )(xcat, xcat, params["w1"])

    scale1, shift1 = _bn_affine(st1, params["g1"], params["b1"], TH * W2)

    # ---- kernel 3: BN1+ReLU -> conv2 + per-tile BN2 partial stats --------------
    a2, st2 = pl.pallas_call(
        _bn_conv2_kernel,
        out_shape=(jax.ShapeDtypeStruct((N, H2, W2, COP), jnp.float32),
                   jax.ShapeDtypeStruct((N, nTH, 2, COP), jnp.float32)),
        grid=(N, nTH),
        in_specs=[
            pl.BlockSpec((1, TH, W2, CMP), lambda n, t: (n, t, 0, 0)),
            pl.BlockSpec((1, 1, W2, CMP),
                         lambda n, t: (n, jnp.maximum(t * TH - 1, 0), 0, 0)),
            pl.BlockSpec((1, 1, W2, CMP),
                         lambda n, t: (n, jnp.minimum((t + 1) * TH, H2 - 1), 0, 0)),
            pl.BlockSpec((1, CMP), lambda n, t: (0, 0)),
            pl.BlockSpec((1, CMP), lambda n, t: (0, 0)),
            pl.BlockSpec((9 * CMP, COP), lambda n, t: (0, 0)),
        ],
        out_specs=(pl.BlockSpec((1, TH, W2, COP), lambda n, t: (n, t, 0, 0)),
                   pl.BlockSpec((1, 1, 2, COP), lambda n, t: (n, t, 0, 0))),
        scratch_shapes=[pltpu.VMEM((TH + 2, W2 + 2, CMP), jnp.bfloat16),
                        pltpu.VMEM((TH * W2, 9 * CMP), jnp.bfloat16)],
        compiler_params=cp(("parallel", "parallel")),
    )(a1, a1, a1, scale1, shift1, params["w2"])

    scale2, shift2 = _bn_affine(st2, params["g2"], params["b2"], TH * W2)

    # ---- kernel 4: BN2 + ReLU (lane-dense output) ------------------------------
    y = pl.pallas_call(
        _bn_relu_kernel,
        out_shape=jax.ShapeDtypeStruct((N, H2, W2, COP), jnp.float32),
        grid=(N, nTH),
        in_specs=[
            pl.BlockSpec((1, TH, W2, COP), lambda n, t: (n, t, 0, 0)),
            pl.BlockSpec((1, COP), lambda n, t: (0, 0)),
            pl.BlockSpec((1, COP), lambda n, t: (0, 0)),
        ],
        out_specs=pl.BlockSpec((1, TH, W2, COP), lambda n, t: (n, t, 0, 0)),
        compiler_params=cp(("parallel", "parallel")),
    )(a2, scale2, shift2)

    return jnp.transpose(y[..., :Cout], (0, 3, 1, 2))       # NHWC(padded) -> NCHW


# ---------------------------------------------------------------------------
# Parameters (deterministic, PyTorch-default-style init)
# ---------------------------------------------------------------------------
def _conv_weight_oihw(key, cin, cout):
    bound = 1.0 / float(np.sqrt(cin * 9))
    return jax.random.uniform(key, (cout, cin, 3, 3), jnp.float32, -bound, bound)


def init_params(key, in_channels, out_channels):
    """DoubleConv(in_channels, out_channels) params in im2col layout.

    Conv biases are omitted: under training-mode BatchNorm a per-channel constant
    bias cancels exactly in (x - batch_mean).  Weights are zero-padded on the
    output-channel axis to a multiple of 128 lanes and cast to bf16 (MXU
    operands); BN gamma/beta are zero-padded so padded channels stay exactly 0.
    """
    k1, k2 = jax.random.split(key)
    cm = out_channels
    cmp_, cop = _rup(cm), _rup(out_channels)

    w1_oihw = _conv_weight_oihw(k1, in_channels, cm)
    w2_oihw = _conv_weight_oihw(k2, cm, out_channels)

    w1_hwio = jnp.transpose(w1_oihw, (2, 3, 1, 0))                    # (3,3,CIN,cm)
    w1_k = jnp.zeros((9 * in_channels, cmp_), jnp.float32)
    w1_k = w1_k.at[:, :cm].set(w1_hwio.reshape(9 * in_channels, cm))

    w2_hwio = jnp.transpose(w2_oihw, (2, 3, 1, 0))                    # (3,3,cm,cout)
    w2_pad = jnp.zeros((3, 3, cmp_, cop), jnp.float32)
    w2_pad = w2_pad.at[:, :, :cm, :out_channels].set(w2_hwio)
    w2_k = w2_pad.reshape(9 * cmp_, cop)

    def padvec(v, n):
        return jnp.zeros((n,), jnp.float32).at[:v.shape[0]].set(v)

    return {
        "cout": out_channels,
        "w1": w1_k.astype(jnp.bfloat16),
        "w2": w2_k.astype(jnp.bfloat16),
        "g1": padvec(jnp.ones((cm,), jnp.float32), cmp_),
        "b1": padvec(jnp.zeros((cm,), jnp.float32), cmp_),
        "g2": padvec(jnp.ones((out_channels,), jnp.float32), cop),
        "b2": padvec(jnp.zeros((out_channels,), jnp.float32), cop),
        # raw f32 copies only for the pure-JAX reference check below
        "raw_w1": w1_oihw,
        "raw_w2": w2_oihw,
    }
    # TODO(synk): BatchNorm running_mean/running_var (train-mode side effect) is
    # not maintained; only the training-mode forward activations are produced.


# ---------------------------------------------------------------------------
# Pure-JAX f32 reference (training-mode BN, gamma=1, beta=0) for sanity checking
# ---------------------------------------------------------------------------
def _reference_up_forward(params, x1_nchw, x2_nchw):
    N, C1, H1, W1 = x1_nchw.shape
    _, C2, H2, W2 = x2_nchw.shape
    Hu, Wu = 2 * H1, 2 * W1
    rh = jnp.asarray(_interp_matrix(H1, Hu))
    rw = jnp.asarray(_interp_matrix(W1, Wu))
    up = jnp.einsum("uh,vw,nchw->ncuv", rh, rw, x1_nchw.astype(jnp.float32))
    pt, plft = (H2 - Hu) // 2, (W2 - Wu) // 2
    up = jnp.pad(up, ((0, 0), (0, 0), (pt, H2 - Hu - pt), (plft, W2 - Wu - plft)))
    x = jnp.concatenate([x2_nchw.astype(jnp.float32), up], axis=1)

    def conv_bn_relu(x, w):
        y = jax.lax.conv_general_dilated(
            x, w, (1, 1), "SAME", dimension_numbers=("NCHW", "OIHW", "NCHW"))
        mu = jnp.mean(y, axis=(0, 2, 3), keepdims=True)
        var = jnp.mean((y - mu) ** 2, axis=(0, 2, 3), keepdims=True)
        return jnp.maximum((y - mu) * jax.lax.rsqrt(var + BN_EPS), 0.0)

    x = conv_bn_relu(x, params["raw_w1"])
    return conv_bn_relu(x, params["raw_w2"])


# ---------------------------------------------------------------------------
if __name__ == "__main__":
    key = jax.random.PRNGKey(0)
    k_x1, k_x2, k_p = jax.random.split(key, 3)

    in_channels, out_channels = 4, 8          # Up(4, 8, bilinear=True)
    N = 2
    c1 = in_channels // 2                     # channels of x1 (low-res feature map)
    c2 = in_channels - c1                     # channels of x2 (skip connection)
    H2 = W2 = 16
    H1 = W1 = 8                               # x1 is at half resolution

    x1 = jax.random.normal(k_x1, (N, c1, H1, W1), jnp.float32)
    x2 = jax.random.normal(k_x2, (N, c2, H2, W2), jnp.float32)
    params = init_params(k_p, in_channels, out_channels)

    out = up_forward(params, x1, x2)
    jax.block_until_ready(out)
    assert out.shape == (N, out_channels, H2, W2)

    ref = _reference_up_forward(params, x1, x2)
    err = float(jnp.max(jnp.abs(out - ref)))
    assert err < 0.25, f"max abs error vs f32 reference: {err}"

    print("KERNEL_OK")
</pallas_src>

<mosaic_0001>
module attributes {stable_mosaic.version = 11 : i64} {
  func.func @_upsample_pack_kernel(%arg0: i32, %arg1: memref<1x8x8x2xf32, #tpu.memory_space<vmem>>, %arg2: memref<1x16x16x2xf32, #tpu.memory_space<vmem>>, %arg3: memref<16x8xbf16, #tpu.memory_space<vmem>>, %arg4: memref<16x8xbf16, #tpu.memory_space<vmem>>, %arg5: memref<1x18x18x4xbf16, #tpu.memory_space<vmem>>) attributes {dimension_semantics = [#tpu.dimension_semantics<parallel>], iteration_bounds = array<i64: 2>, scalar_prefetch = 0 : i64, scratch_operands = 0 : i64, tpu.core_type = #tpu.core_type<tc>, window_params = [{transform_indices = @transform_0, window_bounds = array<i64: 1, 8, 8, 2>}, {transform_indices = @transform_1, window_bounds = array<i64: 1, 16, 16, 2>}, {pipeline_mode = #tpu.pipeline_mode<synchronous>, transform_indices = @transform_2, window_bounds = array<i64: 16, 8>}, {pipeline_mode = #tpu.pipeline_mode<synchronous>, transform_indices = @transform_3, window_bounds = array<i64: 16, 8>}, {transform_indices = @transform_4, window_bounds = array<i64: 1, 18, 18, 4>}]} {
    %cst = arith.constant 0.000000e+00 : bf16
    %0 = vector.broadcast %cst : bf16 to vector<1x1x18x4xbf16>
    %c0 = arith.constant 0 : index
    %c0_0 = arith.constant 0 : index
    %c0_1 = arith.constant 0 : index
    %c0_2 = arith.constant 0 : index
    %1 = vector.load %arg5[%c0, %c0_0, %c0_1, %c0_2] : memref<1x18x18x4xbf16, #tpu.memory_space<vmem>>, vector<1x1x18x4xbf16>
    tpu.vector_store %arg5[%c0, %c0_0, %c0_1, %c0_2], %0 {strides = array<i32>} : memref<1x18x18x4xbf16, #tpu.memory_space<vmem>>, vector<1x1x18x4xbf16>,
    %cst_3 = arith.constant 0.000000e+00 : bf16
    %2 = vector.broadcast %cst_3 : bf16 to vector<1x1x18x4xbf16>
    %c0_4 = arith.constant 0 : index
    %c17 = arith.constant 17 : index
    %c0_5 = arith.constant 0 : index
    %c0_6 = arith.constant 0 : index
    %3 = vector.load %arg5[%c0_4, %c17, %c0_5, %c0_6] : memref<1x18x18x4xbf16, #tpu.memory_space<vmem>>, vector<1x1x18x4xbf16>
    tpu.vector_store %arg5[%c0_4, %c17, %c0_5, %c0_6], %2 {strides = array<i32>} : memref<1x18x18x4xbf16, #tpu.memory_space<vmem>>, vector<1x1x18x4xbf16>,
    %cst_7 = arith.constant 0.000000e+00 : bf16
    %4 = vector.broadcast %cst_7 : bf16 to vector<1x16x1x4xbf16>
    %c0_8 = arith.constant 0 : index
    %c1 = arith.constant 1 : index
    %c0_9 = arith.constant 0 : index
    %c0_10 = arith.constant 0 : index
    %5 = vector.load %arg5[%c0_8, %c1, %c0_9, %c0_10] : memref<1x18x18x4xbf16, #tpu.memory_space<vmem>>, vector<1x16x1x4xbf16>
    tpu.vector_store %arg5[%c0_8, %c1, %c0_9, %c0_10], %4 {strides = array<i32>} : memref<1x18x18x4xbf16, #tpu.memory_space<vmem>>, vector<1x16x1x4xbf16>,
    %cst_11 = arith.constant 0.000000e+00 : bf16
    %6 = vector.broadcast %cst_11 : bf16 to vector<1x16x1x4xbf16>
    %c0_12 = arith.constant 0 : index
    %c1_13 = arith.constant 1 : index
    %c17_14 = arith.constant 17 : index
    %c0_15 = arith.constant 0 : index
    %7 = vector.load %arg5[%c0_12, %c1_13, %c17_14, %c0_15] : memref<1x18x18x4xbf16, #tpu.memory_space<vmem>>, vector<1x16x1x4xbf16>
    tpu.vector_store %arg5[%c0_12, %c1_13, %c17_14, %c0_15], %6 {strides = array<i32>} : memref<1x18x18x4xbf16, #tpu.memory_space<vmem>>, vector<1x16x1x4xbf16>,
    %c0_16 = arith.constant 0 : index
    %c0_17 = arith.constant 0 : index
    %c0_18 = arith.constant 0 : index
    %c0_19 = arith.constant 0 : index
    %8 = vector.load %arg2[%c0_16, %c0_17, %c0_18, %c0_19] : memref<1x16x16x2xf32, #tpu.memory_space<vmem>>, vector<1x16x16x2xf32>
    %9 = arith.truncf %8 : vector<1x16x16x2xf32> to vector<1x16x16x2xbf16>
    %c0_20 = arith.constant 0 : index
    %c1_21 = arith.constant 1 : index
    %c1_22 = arith.constant 1 : index
    %c0_23 = arith.constant 0 : index
    %10 = vector.load %arg5[%c0_20, %c1_21, %c1_22, %c0_23] : memref<1x18x18x4xbf16, #tpu.memory_space<vmem>>, vector<1x16x16x2xbf16>
    tpu.vector_store %arg5[%c0_20, %c1_21, %c1_22, %c0_23], %9 {strides = array<i32>} : memref<1x18x18x4xbf16, #tpu.memory_space<vmem>>, vector<1x16x16x2xbf16>,
    %c0_24 = arith.constant 0 : index
    %c0_25 = arith.constant 0 : index
    %c0_26 = arith.constant 0 : index
    %c0_27 = arith.constant 0 : index
    %11 = vector.load %arg1[%c0_24, %c0_25, %c0_26, %c0_27] : memref<1x8x8x2xf32, #tpu.memory_space<vmem>>, vector<1x8x8x2xf32>
    %12 = vector.shape_cast %11 : vector<1x8x8x2xf32> to vector<8x8x2xf32>
    %13 = arith.truncf %12 : vector<8x8x2xf32> to vector<8x8x2xbf16>
    %14 = vector.shape_cast %13 : vector<8x8x2xbf16> to vector<8x16xbf16>
    %c0_28 = arith.constant 0 : index
    %c0_29 = arith.constant 0 : index
    %15 = vector.load %arg3[%c0_28, %c0_29] : memref<16x8xbf16, #tpu.memory_space<vmem>>, vector<16x8xbf16>
    %cst_30 = arith.constant dense<0.000000e+00> : vector<16x16xf32>
    %16 = tpu.matmul %15, %14, %cst_30 {dimension_numbers = #tpu.dot_dimension_numbers<[1], [0], [0], [1], [0, 0, 1, 1], [], []>} : vector<16x8xbf16>, vector<8x16xbf16>, vector<16x16xf32> -> vector<16x16xf32>
    %17 = vector.shape_cast %16 : vector<16x16xf32> to vector<16x8x2xf32>
    %18 = tpu.transpose %17, [1, 0, 2] : vector<16x8x2xf32> -> vector<8x16x2xf32>
    %c0_31 = arith.constant 0 : index
    %c0_32 = arith.constant 0 : index
    %19 = vector.load %arg4[%c0_31, %c0_32] : memref<16x8xbf16, #tpu.memory_space<vmem>>, vector<16x8xbf16>
    %20 = arith.truncf %18 : vector<8x16x2xf32> to vector<8x16x2xbf16>
    %21 = vector.shape_cast %20 : vector<8x16x2xbf16> to vector<8x32xbf16>
    %cst_33 = arith.constant dense<0.000000e+00> : vector<16x32xf32>
    %22 = tpu.matmul %19, %21, %cst_33 {dimension_numbers = #tpu.dot_dimension_numbers<[1], [0], [0], [1], [0, 0, 1, 1], [], []>} : vector<16x8xbf16>, vector<8x32xbf16>, vector<16x32xf32> -> vector<16x32xf32>
    %23 = vector.shape_cast %22 : vector<16x32xf32> to vector<16x16x2xf32>
    %24 = arith.truncf %23 : vector<16x16x2xf32> to vector<16x16x2xbf16>
    %25 = vector.shape_cast %24 : vector<16x16x2xbf16> to vector<1x16x16x2xbf16>
    %c0_34 = arith.constant 0 : index
    %c1_35 = arith.constant 1 : index
    %c1_36 = arith.constant 1 : index
    %c2 = arith.constant 2 : index
    %26 = vector.load %arg5[%c0_34, %c1_35, %c1_36, %c2] : memref<1x18x18x4xbf16, #tpu.memory_space<vmem>>, vector<1x16x16x2xbf16>
    tpu.vector_store %arg5[%c0_34, %c1_35, %c1_36, %c2], %25 {strides = array<i32>} : memref<1x18x18x4xbf16, #tpu.memory_space<vmem>>, vector<1x16x16x2xbf16>,
    return
  }
  func.func @transform_0(%arg0: i32) -> (i32, i32, i32, i32) {
    %c0_i32 = arith.constant 0 : i32
    %c0_i32_0 = arith.constant 0 : i32
    %c0_i32_1 = arith.constant 0 : i32
    %c0_i32_2 = arith.constant 0 : i32
    return %arg0, %c0_i32, %c0_i32_0, %c0_i32_1 : i32, i32, i32, i32
  }
  func.func @transform_1(%arg0: i32) -> (i32, i32, i32, i32) {
    %c0_i32 = arith.constant 0 : i32
    %c0_i32_0 = arith.constant 0 : i32
    %c0_i32_1 = arith.constant 0 : i32
    %c0_i32_2 = arith.constant 0 : i32
    return %arg0, %c0_i32, %c0_i32_0, %c0_i32_1 : i32, i32, i32, i32
  }
  func.func @transform_2(%arg0: i32) -> (i32, i32) {
    %c0_i32 = arith.constant 0 : i32
    %c0_i32_0 = arith.constant 0 : i32
    %c0_i32_1 = arith.constant 0 : i32
    return %c0_i32, %c0_i32_0 : i32, i32
  }
  func.func @transform_3(%arg0: i32) -> (i32, i32) {
    %c0_i32 = arith.constant 0 : i32
    %c0_i32_0 = arith.constant 0 : i32
    %c0_i32_1 = arith.constant 0 : i32
    return %c0_i32, %c0_i32_0 : i32, i32
  }
  func.func @transform_4(%arg0: i32) -> (i32, i32, i32, i32) {
    %c0_i32 = arith.constant 0 : i32
    %c0_i32_0 = arith.constant 0 : i32
    %c0_i32_1 = arith.constant 0 : i32
    %c0_i32_2 = arith.constant 0 : i32
    return %arg0, %c0_i32, %c0_i32_0, %c0_i32_1 : i32, i32, i32, i32
  }
}

</mosaic_0001>

<bundles_post_ra>
// kernel: tpu_custom_call.1
= control target key start
LH: loop header
LB: loop body
LE: loop exit
PB: predicated region body
PF: predicated region fallthrough
CT: control target
= control target key end

     0   :  { %s3851_s15 = smov 0   ;;  %s5381_s0 = inlined_call_operand.vmem [shape: f32[2,8,8,2], index: 0, kind: input, shape index: {}]   ;;  %s5382_s1 = inlined_call_operand.vmem [shape: f32[2,16,16,2], index: 1, kind: input, shape index: {}]   ;;  %s5383_s2 = inlined_call_operand.vmem [shape: bf16[16,8], index: 2, kind: input, shape index: {}]   ;;  %s5384_s3 = inlined_call_operand.vmem [shape: bf16[16,8], index: 3, kind: input, shape index: {}]   ;;  %s5385_s4 = inlined_call_operand.vmem [shape: bf16[2,18,18,4], index: 4, kind: output, shape index: {}]  }
   0x1 LB: > { %s3328_s16 = sadd.s32 4294967295, %s3789_s15   ;;  %p3332_p0 = scmp.ge.s32.totalorder %s3789_s15, 1  ;;  %s3789_s15 = sphi %s3851_s15, %s14_s15  }
   0x2   : > { %p172_p1 = scmp.lt.s32.totalorder %s3789_s15, 3 }
   0x4   : > { %p173_p2 = pnand %p3332_p0, %p172_p1 }
   0x5   : > { %p203_p3 = scmp.lt.s32.totalorder (!%p173_p2), %s3328_s16, 1  ;;  %v917_v0 = vlaneseq (!%p173_p2)  ;;  %v3791_v1 = vmov (!%p173_p2), 1983009808   ;;  %v3792_v5 = vmov (!%p173_p2), 1934713408   ;;  %vm219_vm0 = vcmask (!%p173_p2), 27648  }
   0x6   : > { %176 = sbr.rel (%p173_p2) target bundleno = 1312 (0x520), region = 36  ;;  %v915_v2 = vunpack.c.l.s4 (!%p173_p2), %v3791_v1  ;;  %v932_v6 = vunpack.c.l.s4 (!%p173_p2), %v3792_v5  ;;  %vm222_vm1 = vcmask (!%p173_p2), 24576   ;;  %v3793_v15 = vmov (!%p173_p2), 0   ;;  %s3794_s25 = smov (!%p173_p2), 8  }
   0x7   : > { %v918_v3 = vshrl.u32 (!%p173_p2), %v917_v0, 7  ;;  %s3795_s26 = smov (!%p173_p2), 2   ;;  %v3796_v50 = vmov (!%p173_p2), 0.0   ;;  %vm3797_vm2 = vmmov (!%p173_p2), 0   ;;  %s3798_s27 = smov (!%p173_p2), 6   ;;  %vm1019_vm3 = vcmask (!%p173_p2), 15360  }
   0x8   : > { %v916_v4 = vunpack.c.0.s8 (!%p173_p2), %v915_v2  ;;  %v933_v14 = vunpack.c.0.s8 (!%p173_p2), %v932_v6  ;;  %3725 = vmatprep.subr.bf16.mxu0 (!%p173_p2), %v3796_v50  ;;  %3731 = vmatprep.subr.bf16.mxu1 (!%p173_p2), %v3796_v50  ;;  %s3799_s28 = smov (!%p173_p2), 4   ;;  %s3800_s29 = smov (!%p173_p2), 12   ;;  %vm1023_vm4 = vcmask (!%p173_p2), 31744   ;;  %vm1026_vm5 = vcmask (!%p173_p2), 48128  }
   0x9   : > { %3727 = vmatprep.mubr.msk.bf16.mxu0 (!%p173_p2), %vm3797_vm2, %v3796_v50  ;;  %3733 = vmatprep.mubr.msk.bf16.mxu1 (!%p173_p2), %vm3797_vm2, %v3796_v50  ;;  %s3801_s30 = smov (!%p173_p2), 10   ;;  %s3802_s5 = smov (!%p173_p2), 14   ;;  %vm1029_vm6 = vcmask (!%p173_p2), 64512   ;;  %vm1032_vm7 = vcmask (!%p173_p2), 80896   ;;  %vm1035_vm8 = vcmask (!%p173_p2), 97280   ;;  %vm1038_vm9 = vcmask (!%p173_p2), 113664  }
   0xa   : > { %v3866_v10 = vsub.s32 (!%p173_p2), %v916_v4, %v918_v3  ;;  %v3894_v25 = vsub.s32 (!%p173_p2), %v933_v14, %v918_v3  ;;  %vm1051_vm10 = vcmask (!%p173_p2), 1043456   ;;  %s3803_s8 = smov (!%p173_p2), 126   ;;  %s3804_s9 = smov (!%p173_p2), 124   ;;  %vm1921_vm11 = vcmask (!%p173_p2), 130048  }
   0xb   : > { %s3805_s10 = smov (!%p173_p2), 122   ;;  %s3806_s11 = smov (!%p173_p2), 120   ;;  %vm1924_vm12 = vcmask (!%p173_p2), 146432   ;;  %vm1927_vm13 = vcmask (!%p173_p2), 162816   ;;  %vm1930_vm14 = vcmask (!%p173_p2), 179200   ;;  %vm1933_vm15 = vcmask (!%p173_p2), 195584  }
   0xc   : > { %s3807_s12 = smov (!%p173_p2), 118   ;;  %s3808_s13 = smov (!%p173_p2), 116   ;;  %vm1939_vm2 = vcmask (!%p173_p2), 228352  }
   0xd   : > { %s5408_s16 = smov (!%p203_p3, %s3328_s16), 1  ;;  %s3809_s14 = smov 114  }
   0xe   : > { %s3655_s17 = sshll.u32 %s5408_s16, 6  ;;  %s3737_s18 = smul.u32 216, %s5408_s16 }
   0xf   : > { %s207_s21 = scalar_lea.vmem %s5381_s0, %s3655_s17  ;;  %s3810_s17 = smov 16  }
  0x10   : > { %v897_v7 = vld [vmem:[%s207_s21] sm:$0xff]  ;;  %v898_v8 = vld [vmem:[%s207_s21 + $0x8] sm:$0xff]  ;;  %v899_v9 = vld [vmem:[%s207_s21 + $0x10] sm:$0xff]  ;;  %s3871_s24 = scalar_lea.vmem %s5385_s4, %s3737_s18  ;;  %s3811_s18 = smov 24  }
  0x11   : > { %v900_v11 = vld [vmem:[%s207_s21 + $0x18] sm:$0xff]  ;;  %v901_v12 = vld [vmem:[%s207_s21 + $0x20] sm:$0xff]  ;;  %v902_v13 = vld [vmem:[%s207_s21 + $0x28] sm:$0xff]  ;;  %220 = vst.msk [vmem:[%s3871_s24] sm:$0xf] %vm219_vm0, %v3793_v15  ;;  %s3812_s19 = smov 18  }
  0x12   : > { %221 = vst.msk [vmem:[%s3871_s24 + $0x4] sm:$0xf] %vm219_vm0, %v3793_v15  ;;  %3338 = vst.msk [vmem:[%s3871_s24 + $0xcc] sm:$0xf] %vm219_vm0, %v3793_v15  ;;  %v903_v16 = vld [vmem:[%s207_s21 + $0x30] sm:$0xff]  ;;  %v904_v17 = vld [vmem:[%s207_s21 + $0x38] sm:$0xff]  ;;  %v3517_v18 = vpack.c.bf16 %v901_v12, %v897_v7  ;;  %v3519_v19 = vpack.c.bf16 %v902_v13, %v898_v8 }
  0x13   : > { %223 = vst.msk [vmem:[%s3871_s24 + $0x8] sm:$0x1] %vm222_vm1, %v3793_v15  ;;  %3340 = vst.msk [vmem:[%s3871_s24 + $0xd4] sm:$0x1] %vm222_vm1, %v3793_v15  ;;  %v3518_v20 = vpack.c.bf16 %v903_v16, %v899_v9  ;;  %v3520_v21 = vpack.c.bf16 %v904_v17, %v900_v11  ;;  %v3781_v7 = vld [vmem:[%s5383_s2] sm:$0xff]   ;;  %s3813_s20 = smov 26  }
  0x14   : > { %3339 = vst.msk [vmem:[%s3871_s24 + $0xd0] sm:$0xf] %vm219_vm0, %v3793_v15  ;;  %v920_v22 = vrot.slane %v3517_v18, %v3866_v10  ;;  %v954_v23 = vrot.slane %v3519_v19, %v3866_v10  ;;  %s3814_s21 = smov 20   ;;  %s3815_s22 = smov 28   ;;  %vm1936_vm0 = vcmask 211968  }
  0x15   : > { %v928_v24 = vrot.slane %v3518_v20, %v3866_v10  ;;  %v962_v26 = vrot.slane %v3520_v21, %v3866_v10  ;;  %s3816_s23 = smov 22   ;;  %s3821_s6 = smov 106  }
  0x16   : > { %s3822_s7 = smov 104  }
  0x17   : > { %v929_v27 = vcombine.low %v920_v22, %v928_v24  ;;  %v963_v28 = vcombine.low %v954_v23, %v962_v26  ;;  %v930_v29 = vcombine.high %v920_v22, %v928_v24  ;;  %v964_v30 = vcombine.high %v954_v23, %v962_v26 }
  0x19   : > { %v937_v31 = vrot.slane %v929_v27, %v3894_v25  ;;  %v971_v32 = vrot.slane %v963_v28, %v3894_v25  ;;  %v944_v33 = vrot.slane %v930_v29, %v3894_v25  ;;  %v978_v34 = vrot.slane %v964_v30, %v3894_v25 }
  0x1b   : > { %v984_v35 = vshrl.u32 %v937_v31, 16  ;;  %v985_v36 = vshrl.u32 %v971_v32, 16  ;;  %v995_v37 = vpack.i.b16 %v978_v34, %v944_v33  ;;  %v945_v38 = vcombine.high %v937_v31, %v3793_v15 }
  0x1c   : > { %v979_v39 = vcombine.high %v971_v32, %v3793_v15  ;;  %v983_v42 = vpack.i.b16 %v971_v32, %v937_v31  ;;  %v946_v44 = vcombine.high %v944_v33, %v3793_v15  ;;  %v980_v45 = vcombine.high %v978_v34, %v3793_v15 }
  0x1d   : > { %v986_v40 = vpack.i.b16 %v985_v36, %v984_v35  ;;  %1011 = vrot.lane.b32.xlu1 %v995_v37, %s3794_s25  ;;  %v990_v41 = vshrl.u32 %v945_v38, 16  ;;  %v996_v47 = vshrl.u32 %v944_v33, 16  ;;  %v997_v48 = vshrl.u32 %v978_v34, 16 }
  0x1e   : > { %v991_v43 = vshrl.u32 %v979_v39, 16  ;;  %v989_v46 = vpack.i.b16 %v979_v39, %v945_v38  ;;  %v1001_v51 = vpack.i.b16 %v980_v45, %v946_v44  ;;  %v1002_v53 = vshrl.u32 %v946_v44, 16 }
  0x1f   : > { %1005 = vrot.lane.b32.xlu0 %v986_v40, %s3795_s26  ;;  %v998_v52 = vpack.i.b16 %v997_v48, %v996_v47  ;;  %v1003_v54 = vshrl.u32 %v980_v45, 16 }
  0x20   : > { %v992_v49 = vpack.i.b16 %v991_v43, %v990_v41 }
  0x21   : > { %v1004_v55 = vpack.i.b16 %v1003_v54, %v1002_v53 }
  0x22   : > { %1009 = vrot.lane.b32.xlu1 %v992_v49, %s3798_s27 }
  0x23   : > { %1007 = vrot.lane.b32.xlu0 %v989_v46, %s3799_s28 }
  0x26   : > { %1015 = vrot.lane.b32.xlu1 %v1001_v51, %s3800_s29 }
  0x27   : > { %1013 = vrot.lane.b32.xlu0 %v998_v52, %s3801_s30 }
  0x2b   : > { %1017 = vrot.lane.b32.xlu0 %v1004_v55, %s3802_s5 }
  0x8f   : > { %v1012_v56 = vpop.permute.xlu1 %1011 }
  0x91   : > { %v1006_v57 = vpop.permute.xlu0 %1005 }
  0x92   : > { %v1022_v59 = vsel %vm1019_vm3, %v983_v42, %v1006_v57 }
  0x94   : > { %v1010_v58 = vpop.permute.xlu1 %1009 }
  0x95   : > { %v1008_v60 = vpop.permute.xlu0 %1007 }
  0x96   : > { %v1025_v61 = vsel %vm1023_vm4, %v1022_v59, %v1008_v60 }
  0x97   : > { %v1028_v62 = vsel %vm1026_vm5, %v1025_v61, %v1010_v58 }
  0x98   : > { %v1031_v63 = vsel %vm1029_vm6, %v1028_v62, %v1012_v56  ;;  %v1016_v2 = vpop.permute.xlu1 %1015 }
  0x99   : > { %v1014_v0 = vpop.permute.xlu0 %1013 }
  0x9a   : > { %v1034_v1 = vsel %vm1032_vm7, %v1031_v63, %v1014_v0 }
  0x9b   : > { %v1037_v3 = vsel %vm1035_vm8, %v1034_v1, %v1016_v2 }
  0x9d   : > { %v1018_v4 = vpop.permute.xlu0 %1017 }
  0x9e   : > { %v1040_v5 = vsel %vm1038_vm9, %v1037_v3, %v1018_v4 }
  0x9f   : > { %v1052_v6 = vsel %vm1051_vm10, %v1040_v5, 0 }
  0xa0   : > { %3726 = vmatpush3.bf16.msra.mxu0 %v1052_v6 }
  0xa3   : > { %3728 = vmatmul.mubr.msk.bf16.vlgmr.msra.gmra.mrb[0].mxu0 %vm1029_vm6, %v3781_v7 }
 0x176   : > { %v1088_v8 = vpop.f32.mrb[0].mxu0 }
 0x177   : > { %1097 = vrot.lane.b32.xlu1 %v1088_v8, %s3803_s8  ;;  %v3729_v9 = vpop.f32.mrb[1].mxu0 }
 0x178   : > { %v1091_v11 = vpop.f32.mrb[2].mxu0 }
 0x179   : > { %1099 = vrot.lane.b32.xlu0 %v1091_v11, %s3803_s8  ;;  %v3730_v12 = vpop.f32.mrb[3].mxu0 }
 0x17b   : > { %1103 = vrot.lane.b32.xlu1 %v1088_v8, %s3804_s9 }
 0x17d   : > { %1105 = vrot.lane.b32.xlu0 %v1091_v11, %s3804_s9 }
 0x17f   : > { %1109 = vrot.lane.b32.xlu1 %v1088_v8, %s3805_s10 }
 0x181   : > { %1111 = vrot.lane.b32.xlu0 %v1091_v11, %s3805_s10 }
 0x183   : > { %1115 = vrot.lane.b32.xlu1 %v1088_v8, %s3806_s11 }
 0x185   : > { %1117 = vrot.lane.b32.xlu0 %v1091_v11, %s3806_s11 }
 0x187   : > { %1121 = vrot.lane.b32.xlu1 %v1088_v8, %s3807_s12 }
 0x189   : > { %1123 = vrot.lane.b32.xlu0 %v1091_v11, %s3807_s12 }
 0x18b   : > { %1127 = vrot.lane.b32.xlu1 %v1088_v8, %s3808_s13 }
 0x18d   : > { %1129 = vrot.lane.b32.xlu0 %v1091_v11, %s3808_s13 }
 0x18f   : > { %1133 = vrot.lane.b32.xlu1 %v1088_v8, %s3809_s14 }
 0x191   : > { %1135 = vrot.lane.b32.xlu0 %v1091_v11, %s3809_s14 }
 0x1e9   : > { %v1098_v13 = vpop.permute.xlu1 %1097 }
 0x1eb   : > { %v1100_v14 = vpop.permute.xlu0 %1099 }
 0x1ed   : > { %v1104_v16 = vpop.permute.xlu1 %1103 }
 0x1ee   : > { %v1139_v17 = vcombine.low %v1088_v8, %v1104_v16  ;;  %v1140_v18 = vcombine.high %v1088_v8, %v1104_v16 }
 0x1ef   : > { %v1106_v19 = vpop.permute.xlu0 %1105 }
 0x1f0   : > { %v1147_v23 = vrot.slane %v1139_v17, %v3866_v10  ;;  %v1154_v24 = vrot.slane %v1140_v18, %v3866_v10  ;;  %v1275_v26 = vcombine.low %v1091_v11, %v1106_v19  ;;  %v1276_v27 = vcombine.high %v1091_v11, %v1106_v19 }
 0x1f1   : > { %v1110_v20 = vpop.permute.xlu1 %1109 }
 0x1f2   : > { %v1155_v21 = vcombine.low %v1098_v13, %v1110_v20  ;;  %v1156_v22 = vcombine.high %v1098_v13, %v1110_v20  ;;  %v1283_v38 = vrot.slane %v1275_v26, %v3866_v10  ;;  %v1290_v39 = vrot.slane %v1276_v27, %v3866_v10 }
 0x1f3   : > { %v1112_v28 = vpop.permute.xlu0 %1111 }
 0x1f4   : > { %v1163_v29 = vrot.slane %v1155_v21, %v3866_v10  ;;  %v1170_v30 = vrot.slane %v1156_v22, %v3866_v10  ;;  %v1291_v31 = vcombine.low %v1100_v14, %v1112_v28  ;;  %v1292_v32 = vcombine.high %v1100_v14, %v1112_v28 }
 0x1f5   : > { %v3942_v33 = vpop.permute.xlu1 %1115 }
 0x1f6   : > { %v1203_v34 = vcombine.low %v1147_v23, %v1163_v29  ;;  %v1204_v35 = vcombine.high %v1147_v23, %v1163_v29  ;;  %v1219_v36 = vcombine.low %v1154_v24, %v1170_v30  ;;  %v1220_v37 = vcombine.high %v1154_v24, %v1170_v30 }
 0x1f7   : > { %v1299_v40 = vrot.slane %v1291_v31, %v3866_v10  ;;  %v1306_v41 = vrot.slane %v1292_v32, %v3866_v10  ;;  %v1118_v42 = vpop.permute.xlu0 %1117 }
 0x1f8   : > { %v1211_v43 = vrot.slane %v1203_v34, %v3894_v25  ;;  %v1218_v44 = vrot.slane %v1204_v35, %v3894_v25  ;;  %v1227_v45 = vrot.slane %v1219_v36, %v3894_v25  ;;  %v1234_v46 = vrot.slane %v1220_v37, %v3894_v25 }
 0x1f9   : > { %v1339_v47 = vcombine.low %v1283_v38, %v1299_v40  ;;  %v1340_v48 = vcombine.high %v1283_v38, %v1299_v40  ;;  %v1355_v49 = vcombine.low %v1290_v39, %v1306_v41  ;;  %v1356_v50 = vcombine.high %v1290_v39, %v1306_v41  ;;  %v1122_v51 = vpop.permute.xlu1 %1121 }
 0x1fa   : > { %v3523_v52 = vcombine.low %v1211_v43, %v1218_v44  ;;  %v3525_v53 = vcombine.high %v1211_v43, %v1218_v44  ;;  %v3527_v54 = vcombine.low %v1227_v45, %v1234_v46  ;;  %v3529_v55 = vcombine.high %v1227_v45, %v1234_v46 }
 0x1fb   : > { %v1347_v56 = vrot.slane %v1339_v47, %v3894_v25  ;;  %v1354_v57 = vrot.slane %v1340_v48, %v3894_v25  ;;  %v1363_v58 = vrot.slane %v1355_v49, %v3894_v25  ;;  %v1370_v59 = vrot.slane %v1356_v50, %v3894_v25  ;;  %v1124_v60 = vpop.permute.xlu0 %1123 }
 0x1fc   : > { %v1419_v61 = vrot.slane %v3523_v52, %v3866_v10  ;;  %v1435_v62 = vrot.slane %v3525_v53, %v3866_v10  ;;  %v1451_v63 = vrot.slane %v3527_v54, %v3866_v10  ;;  %v1467_v0 = vrot.slane %v3529_v55, %v3866_v10 }
 0x1fd   : > { %v3531_v1 = vcombine.low %v1347_v56, %v1354_v57  ;;  %v3533_v2 = vcombine.high %v1347_v56, %v1354_v57  ;;  %v3535_v3 = vcombine.low %v1363_v58, %v1370_v59  ;;  %v3537_v4 = vcombine.high %v1363_v58, %v1370_v59  ;;  %v1128_v5 = vpop.permute.xlu1 %1127 }
 0x1fe   : > { %v1475_v6 = vcombine.low %v1419_v61, %v1435_v62  ;;  %v1476_v7 = vcombine.high %v1419_v61, %v1435_v62  ;;  %v1507_v8 = vcombine.low %v1451_v63, %v1467_v0  ;;  %v1508_v9 = vcombine.high %v1451_v63, %v1467_v0 }
 0x1ff   : > { %v1555_v11 = vrot.slane %v3531_v1, %v3866_v10  ;;  %v1571_v12 = vrot.slane %v3533_v2, %v3866_v10  ;;  %v1587_v13 = vrot.slane %v3535_v3, %v3866_v10  ;;  %v1603_v14 = vrot.slane %v3537_v4, %v3866_v10  ;;  %v1130_v16 = vpop.permute.xlu0 %1129 }
 0x200   : > { %v3965_v17 = vrot.slane %v1475_v6, %v3894_v25  ;;  %v3968_v18 = vrot.slane %v1476_v7, %v3894_v25  ;;  %v3971_v19 = vrot.slane %v1507_v8, %v3894_v25  ;;  %v3974_v20 = vrot.slane %v1508_v9, %v3894_v25 }
 0x201   : > { %v1611_v21 = vcombine.low %v1555_v11, %v1571_v12  ;;  %v1612_v22 = vcombine.high %v1555_v11, %v1571_v12  ;;  %v1643_v23 = vcombine.low %v1587_v13, %v1603_v14  ;;  %v1644_v24 = vcombine.high %v1587_v13, %v1603_v14  ;;  %v1134_v30 = vpop.permute.xlu1 %1133 }
 0x202   : > { %v1171_v26 = vcombine.low %v3942_v33, %v1128_v5  ;;  %v1172_v27 = vcombine.high %v3942_v33, %v1128_v5  ;;  %v1307_v28 = vcombine.low %v1118_v42, %v1130_v16  ;;  %v1308_v29 = vcombine.high %v1118_v42, %v1130_v16 }
 0x203   : > { %v3979_v31 = vrot.slane %v1611_v21, %v3894_v25  ;;  %v3982_v32 = vrot.slane %v1612_v22, %v3894_v25  ;;  %v3985_v34 = vrot.slane %v1643_v23, %v3894_v25  ;;  %v3988_v35 = vrot.slane %v1644_v24, %v3894_v25  ;;  %v1136_v36 = vpop.permute.xlu0 %1135 }
 0x204   : > { %v1179_v37 = vrot.slane %v1171_v26, %v3866_v10  ;;  %v1186_v33 = vrot.slane %v1172_v27, %v3866_v10  ;;  %v1315_v38 = vrot.slane %v1307_v28, %v3866_v10  ;;  %v1322_v39 = vrot.slane %v1308_v29, %v3866_v10 }
 0x205   : > { %v1187_v40 = vcombine.low %v1122_v51, %v1134_v30  ;;  %v1188_v41 = vcombine.high %v1122_v51, %v1134_v30  ;;  %v1323_v42 = vcombine.low %v1124_v60, %v1136_v36  ;;  %v1324_v43 = vcombine.high %v1124_v60, %v1136_v36 }
 0x206   : > { %v1539_v44 = vcombine.low %v3965_v17, %v3971_v19  ;;  %v1540_v45 = vcombine.high %v3965_v17, %v3971_v19  ;;  %v1541_v46 = vcombine.low %v3968_v18, %v3974_v20  ;;  %v1542_v47 = vcombine.high %v3968_v18, %v3974_v20 }
 0x207   : > { %v1195_v48 = vrot.slane %v1187_v40, %v3866_v10  ;;  %v1202_v49 = vrot.slane %v1188_v41, %v3866_v10  ;;  %v1331_v50 = vrot.slane %v1323_v42, %v3866_v10  ;;  %v1338_v51 = vrot.slane %v1324_v43, %v3866_v10 }
 0x208   : > { %v1675_v52 = vcombine.low %v3979_v31, %v3985_v34  ;;  %v1676_v53 = vcombine.high %v3979_v31, %v3985_v34  ;;  %v1677_v54 = vcombine.low %v3982_v32, %v3988_v35  ;;  %v1678_v55 = vcombine.high %v3982_v32, %v3988_v35 }
 0x209   : > { %v1235_v56 = vcombine.low %v1179_v37, %v1195_v48  ;;  %v1236_v57 = vcombine.high %v1179_v37, %v1195_v48  ;;  %v1251_v58 = vcombine.low %v1186_v33, %v1202_v49  ;;  %v1252_v59 = vcombine.high %v1186_v33, %v1202_v49 }
 0x20a   : > { %v1371_v60 = vcombine.low %v1315_v38, %v1331_v50  ;;  %v1372_v61 = vcombine.high %v1315_v38, %v1331_v50  ;;  %v1387_v62 = vcombine.low %v1322_v39, %v1338_v51  ;;  %v1388_v63 = vcombine.high %v1322_v39, %v1338_v51 }
 0x20b   : > { %v1243_v0 = vrot.slane %v1235_v56, %v3894_v25  ;;  %v1250_v1 = vrot.slane %v1236_v57, %v3894_v25  ;;  %v1259_v2 = vrot.slane %v1251_v58, %v3894_v25  ;;  %v1266_v3 = vrot.slane %v1252_v59, %v3894_v25 }
 0x20c   : > { %v1379_v4 = vrot.slane %v1371_v60, %v3894_v25  ;;  %v1386_v5 = vrot.slane %v1372_v61, %v3894_v25  ;;  %v1395_v6 = vrot.slane %v1387_v62, %v3894_v25  ;;  %v1402_v7 = vrot.slane %v1388_v63, %v3894_v25 }
 0x20d   : > { %v3524_v8 = vcombine.low %v1243_v0, %v1250_v1  ;;  %v3526_v9 = vcombine.high %v1243_v0, %v1250_v1  ;;  %v3528_v11 = vcombine.low %v1259_v2, %v1266_v3  ;;  %v3530_v12 = vcombine.high %v1259_v2, %v1266_v3 }
 0x20e   : > { %v3532_v13 = vcombine.low %v1379_v4, %v1386_v5  ;;  %v3534_v14 = vcombine.high %v1379_v4, %v1386_v5  ;;  %v3536_v16 = vcombine.low %v1395_v6, %v1402_v7  ;;  %v3538_v21 = vcombine.high %v1395_v6, %v1402_v7 }
 0x20f   : > { %v1426_v22 = vrot.slane %v3524_v8, %v3866_v10  ;;  %v1442_v23 = vrot.slane %v3526_v9, %v3866_v10  ;;  %v1458_v24 = vrot.slane %v3528_v11, %v3866_v10  ;;  %v1474_v26 = vrot.slane %v3530_v12, %v3866_v10 }
 0x210   : > { %v1562_v27 = vrot.slane %v3532_v13, %v3866_v10  ;;  %v1578_v28 = vrot.slane %v3534_v14, %v3866_v10  ;;  %v1594_v29 = vrot.slane %v3536_v16, %v3866_v10  ;;  %v1610_v30 = vrot.slane %v3538_v21, %v3866_v10 }
 0x211   : > { %v1491_v31 = vcombine.low %v1426_v22, %v1442_v23  ;;  %v1492_v32 = vcombine.high %v1426_v22, %v1442_v23  ;;  %v1523_v34 = vcombine.low %v1458_v24, %v1474_v26  ;;  %v1524_v35 = vcombine.high %v1458_v24, %v1474_v26 }
 0x212   : > { %v1627_v36 = vcombine.low %v1562_v27, %v1578_v28  ;;  %v1628_v37 = vcombine.high %v1562_v27, %v1578_v28  ;;  %v1659_v33 = vcombine.low %v1594_v29, %v1610_v30  ;;  %v1660_v38 = vcombine.high %v1594_v29, %v1610_v30 }
 0x213   : > { %v1499_v39 = vrot.slane %v1491_v31, %v3894_v25  ;;  %v1506_v40 = vrot.slane %v1492_v32, %v3894_v25  ;;  %v1531_v41 = vrot.slane %v1523_v34, %v3894_v25  ;;  %v1538_v42 = vrot.slane %v1524_v35, %v3894_v25 }
 0x214   : > { %v1635_v43 = vrot.slane %v1627_v36, %v3894_v25  ;;  %v1642_v48 = vrot.slane %v1628_v37, %v3894_v25  ;;  %v1667_v49 = vrot.slane %v1659_v33, %v3894_v25  ;;  %v1674_v50 = vrot.slane %v1660_v38, %v3894_v25 }
 0x215   : > { %v1543_v51 = vcombine.low %v1499_v39, %v1531_v41  ;;  %v1544_v56 = vcombine.high %v1499_v39, %v1531_v41  ;;  %v1545_v57 = vcombine.low %v1506_v40, %v1538_v42  ;;  %v1546_v58 = vcombine.high %v1506_v40, %v1538_v42 }
 0x216   : > { %v1679_v59 = vcombine.low %v1635_v43, %v1667_v49  ;;  %v1680_v60 = vcombine.high %v1635_v43, %v1667_v49  ;;  %v1681_v61 = vcombine.low %v1642_v48, %v1674_v50  ;;  %v1682_v62 = vcombine.high %v1642_v48, %v1674_v50 }
 0x217   : > { %v1685_v63 = vpack.c.bf16 %v1675_v52, %v1539_v44  ;;  %v1686_v0 = vpack.c.bf16 %v1676_v53, %v1540_v45  ;;  %v1687_v1 = vpack.c.bf16 %v1677_v54, %v1541_v46  ;;  %v1688_v2 = vpack.c.bf16 %v1678_v55, %v1542_v47 }
 0x218   : > { %v1689_v3 = vpack.c.bf16 %v1679_v59, %v1543_v51  ;;  %v1690_v4 = vpack.c.bf16 %v1680_v60, %v1544_v56  ;;  %v1691_v5 = vpack.c.bf16 %v1681_v61, %v1545_v57  ;;  %v1692_v6 = vpack.c.bf16 %v1682_v62, %v1546_v58 }
 0x219   : > { %v1695_v7 = vpack.i.b16 %v1686_v0, %v1685_v63  ;;  %v1703_v8 = vpack.i.b16 %v1688_v2, %v1687_v1  ;;  %v1697_v9 = vshrl.u32 %v1685_v63, 16  ;;  %v1698_v44 = vshrl.u32 %v1686_v0, 16 }
 0x21a   : > { %v1711_v52 = vpack.i.b16 %v1690_v4, %v1689_v3  ;;  %v1719_v11 = vpack.i.b16 %v1692_v6, %v1691_v5  ;;  %v1705_v17 = vshrl.u32 %v1687_v1, 16  ;;  %v1706_v19 = vshrl.u32 %v1688_v2, 16 }
 0x21b   : > { %v1699_v45 = vpack.i.b16 %v1698_v44, %v1697_v9  ;;  %v1713_v53 = vshrl.u32 %v1689_v3, 16  ;;  %v1714_v12 = vshrl.u32 %v1690_v4, 16  ;;  %v1721_v46 = vshrl.u32 %v1691_v5, 16 }
 0x21c   : > { %v1725_v54 = vcombine.low %v1695_v7, %v1711_v52  ;;  %v1741_v13 = vcombine.low %v1703_v8, %v1719_v11  ;;  %v1707_v18 = vpack.i.b16 %v1706_v19, %v1705_v17  ;;  %v1722_v20 = vshrl.u32 %v1692_v6, 16 }
 0x21d   : > { %v1715_v47 = vpack.i.b16 %v1714_v12, %v1713_v53  ;;  %v1726_v55 = vcombine.high %v1695_v7, %v1711_v52  ;;  %v1742_v14 = vcombine.high %v1703_v8, %v1719_v11 }
 0x21e   : > { %v1733_v16 = vrot.slane %v1725_v54, %v3866_v10  ;;  %v1749_v21 = vrot.slane %v1741_v13, %v3866_v10  ;;  %v1723_v22 = vpack.i.b16 %v1722_v20, %v1721_v46 }
 0x21f   : > { %v1793_v23 = vcombine.low %v1699_v45, %v1715_v47  ;;  %v1740_v24 = vrot.slane %v1726_v55, %v3866_v10  ;;  %v1756_v26 = vrot.slane %v1742_v14, %v3866_v10  ;;  %v1794_v27 = vcombine.high %v1699_v45, %v1715_v47 }
 0x220   : > { %v1758_v28 = vcombine.high %v1733_v16, %v1749_v21  ;;  %v1809_v29 = vcombine.low %v1707_v18, %v1723_v22  ;;  %v1810_v30 = vcombine.high %v1707_v18, %v1723_v22  ;;  %v1757_v31 = vcombine.low %v1733_v16, %v1749_v21 }
 0x221   : > { %v1801_v32 = vrot.slane %v1793_v23, %v3866_v10  ;;  %v1773_v34 = vcombine.low %v1740_v24, %v1756_v26  ;;  %v1774_v35 = vcombine.high %v1740_v24, %v1756_v26  ;;  %v1808_v36 = vrot.slane %v1794_v27, %v3866_v10  ;;  %v3782_v27 = vld [vmem:[%s5384_s3] sm:$0xff]  }
 0x222   : > { %v1772_v37 = vrot.slane %v1758_v28, %v3894_v25  ;;  %v1817_v33 = vrot.slane %v1809_v29, %v3866_v10  ;;  %v1824_v38 = vrot.slane %v1810_v30, %v3866_v10  ;;  %v1765_v51 = vrot.slane %v1757_v31, %v3894_v25 }
 0x223   : > { %v1781_v48 = vrot.slane %v1773_v34, %v3894_v25  ;;  %v1788_v50 = vrot.slane %v1774_v35, %v3894_v25 }
 0x224   : > { %1871 = vrot.lane.b32.xlu0 %v1772_v37, %s3794_s25  ;;  %v1825_v39 = vcombine.low %v1801_v32, %v1817_v33  ;;  %v1826_v40 = vcombine.high %v1801_v32, %v1817_v33  ;;  %v1841_v41 = vcombine.low %v1808_v36, %v1824_v38  ;;  %v1842_v42 = vcombine.high %v1808_v36, %v1824_v38  ;;  %s3817_s25 = smov 30  }
 0x225   : > { %v1789_v57 = vcombine.high %v1765_v51, %v3793_v15  ;;  %v1790_v59 = vcombine.high %v1772_v37, %v3793_v15  ;;  %v1791_v61 = vcombine.high %v1781_v48, %v3793_v15  ;;  %v1792_v63 = vcombine.high %v1788_v50, %v3793_v15 }
 0x226   : > { %v1833_v43 = vrot.slane %v1825_v39, %v3894_v25  ;;  %v1840_v49 = vrot.slane %v1826_v40, %v3894_v25  ;;  %v1849_v56 = vrot.slane %v1841_v41, %v3894_v25  ;;  %v1856_v58 = vrot.slane %v1842_v42, %v3894_v25 }
 0x228   : > { %1862 = vrot.lane.b32.xlu1 %v1833_v43, %s3795_s26  ;;  %1883 = vrot.lane.b32.xlu0 %v1781_v48, %s3810_s17  ;;  %v1857_v60 = vcombine.high %v1833_v43, %v3793_v15  ;;  %v1858_v62 = vcombine.high %v1840_v49, %v3793_v15  ;;  %v1859_v0 = vcombine.high %v1849_v56, %v3793_v15 }
 0x229   : > { %v1860_v1 = vcombine.high %v1856_v58, %v3793_v15 }
 0x22c   : > { %1874 = vrot.lane.b32.xlu1 %v1840_v49, %s3801_s30  ;;  %1895 = vrot.lane.b32.xlu0 %v1788_v50, %s3811_s18  ;;  %s3819_s30 = smov 110  }
 0x230   : > { %1886 = vrot.lane.b32.xlu1 %v1849_v56, %s3812_s19  ;;  %1865 = vrot.lane.b32.xlu0 %v1789_v57, %s3799_s28 }
 0x234   : > { %1898 = vrot.lane.b32.xlu1 %v1856_v58, %s3813_s20  ;;  %1877 = vrot.lane.b32.xlu0 %v1790_v59, %s3800_s29  ;;  %s3818_s29 = smov 112  }
 0x238   : > { %1868 = vrot.lane.b32.xlu1 %v1857_v60, %s3798_s27  ;;  %1889 = vrot.lane.b32.xlu0 %v1791_v61, %s3814_s21 }
 0x23c   : > { %1880 = vrot.lane.b32.xlu1 %v1858_v62, %s3802_s5  ;;  %1901 = vrot.lane.b32.xlu0 %v1792_v63, %s3815_s22  ;;  %s3820_s5 = smov 108  }
 0x240   : > { %1892 = vrot.lane.b32.xlu1 %v1859_v0, %s3816_s23 }
 0x244   : > { %1904 = vrot.lane.b32.xlu1 %v1860_v1, %s3817_s25 }
 0x296   : > { %v1872_v2 = vpop.permute.xlu0 %1871 }
 0x29a   : > { %v1863_v3 = vpop.permute.xlu1 %1862  ;;  %v1884_v4 = vpop.permute.xlu0 %1883 }
 0x29b   : > { %v1908_v44 = vsel %vm1019_vm3, %v1765_v51, %v1863_v3  ;;  %vm1942_vm3 = vcmask 244736  }
 0x29e   : > { %v1875_v5 = vpop.permute.xlu1 %1874  ;;  %v1896_v6 = vpop.permute.xlu0 %1895 }
 0x2a2   : > { %v1887_v7 = vpop.permute.xlu1 %1886  ;;  %v1866_v8 = vpop.permute.xlu0 %1865 }
 0x2a3   : > { %v1910_v11 = vsel %vm1023_vm4, %v1908_v44, %v1866_v8  ;;  %vm230_vm4 = vsmask.f32 256 }
 0x2a6   : > { %v1899_v9 = vpop.permute.xlu1 %1898  ;;  %v1878_v52 = vpop.permute.xlu0 %1877 }
 0x2aa   : > { %v1869_v17 = vpop.permute.xlu1 %1868  ;;  %v1890_v46 = vpop.permute.xlu0 %1889 }
 0x2ab   : > { %v1912_v19 = vsel %vm1026_vm5, %v1910_v11, %v1869_v17  ;;  %vm4171_vm5 = vmand %vm222_vm1, %vm230_vm4 }
 0x2ac   : > { %v1914_v15 = vsel %vm1029_vm6, %v1912_v19, %v1872_v2 }
 0x2ad   : > { %v1916_v45 = vsel %vm1032_vm7, %v1914_v15, %v1875_v5 }
 0x2ae   : > { %v1881_v53 = vpop.permute.xlu1 %1880  ;;  %v1918_v12 = vsel %vm1035_vm8, %v1916_v45, %v1878_v52  ;;  %v1902_v16 = vpop.permute.xlu0 %1901  ;;  %vm280_vm8 = vsmask.f32 7938 }
 0x2af   : > { %v1920_v54 = vsel %vm1038_vm9, %v1918_v12, %v1881_v53  ;;  %vm780_vm9 = vcmask 11264  }
 0x2b0   : > { %v1923_v13 = vsel %vm1921_vm11, %v1920_v54, %v1884_v4  ;;  %vm4587_vm11 = vmand %vm222_vm1, %vm280_vm8  ;;  %vm787_vm1 = vcmask 8192  }
 0x2b1   : > { %v1926_v18 = vsel %vm1924_vm12, %v1923_v13, %v1887_v7  ;;  %vm4679_vm12 = vmand %vm787_vm1, %vm230_vm4 }
 0x2b2   : > { %v1893_v20 = vpop.permute.xlu1 %1892  ;;  %v1929_v47 = vsel %vm1927_vm13, %v1926_v18, %v1890_v46  ;;  %vm3144_vm13 = vcmask 27664  }
 0x2b3   : > { %v1932_v55 = vsel %vm1930_vm14, %v1929_v47, %v1893_v20  ;;  %vm5041_vm14 = vmand %vm3144_vm13, %vm280_vm8 }
 0x2b4   : > { %v1935_v14 = vsel %vm1933_vm15, %v1932_v55, %v1896_v6  ;;  %vm3151_vm15 = vcmask 24592  }
 0x2b5   : > { %v1938_v21 = vsel %vm1936_vm0, %v1935_v14, %v1899_v9  ;;  %vm5222_vm0 = vmand %vm3151_vm15, %vm230_vm4 }
 0x2b6   : > { %v1905_v22 = vpop.permute.xlu1 %1904  ;;  %v1941_v23 = vsel %vm1939_vm2, %v1938_v21, %v1902_v16 }
 0x2b7   : > { %v1944_v24 = vsel %vm1942_vm3, %v1941_v23, %v1905_v22 }
 0x2b8   : > { %v1953_v26 = vsel %vm1051_vm10, %v1944_v24, 0  ;;  %vm4575_vm10 = vmand %vm780_vm9, %vm280_vm8 }
 0x2b9   : > { %3732 = vmatpush3.bf16.msra.mxu1 %v1953_v26  ;;  %v3341_v26 = vld [vmem:[%s3871_s24 + $0xc] sm:$0x1] }
 0x2bc   : > { %3734 = vmatmul.mubr.msk.bf16.vlgmr.msra.gmra.mrb[0].mxu1 %vm1029_vm6, %v3782_v27  ;;  %vm458_vm6 = vsmask.f32 4368 }
 0x2bd   : > { %vm4350_vm7 = vmor %vm230_vm4, %vm458_vm6 }
 0x38f   : > { %v4093_v28 = vpop.f32.mrb[0].mxu1 }
 0x390   : > { %1998 = vrot.lane.b32.xlu0 %v4093_v28, %s3803_s8  ;;  %v3735_v29 = vpop.f32.mrb[1].mxu1 }
 0x391   : > { %v4097_v30 = vpop.f32.mrb[2].mxu1 }
 0x392   : > { %2000 = vrot.lane.b32.xlu1 %v4097_v30, %s3803_s8  ;;  %v3736_v31 = vpop.f32.mrb[3].mxu1  ;;  %s3823_s8 = smov 102  }
 0x393   : > { %v233_v31 = vsel %vm4171_vm5, 0, %v3341_v26 }
 0x394   : > { %2004 = vrot.lane.b32.xlu0 %v4093_v28, %s3804_s9  ;;  %3342 = vst [vmem:[%s3871_s24 + $0xc] sm:$0x1] %v233_v31 }
 0x396   : > { %2006 = vrot.lane.b32.xlu1 %v4097_v30, %s3804_s9  ;;  %s3824_s9 = smov 100  }
 0x398   : > { %2010 = vrot.lane.b32.xlu0 %v4093_v28, %s3805_s10 }
 0x39a   : > { %2012 = vrot.lane.b32.xlu1 %v4097_v30, %s3805_s10  ;;  %s3825_s10 = smov 98  }
 0x39c   : > { %2016 = vrot.lane.b32.xlu0 %v4093_v28, %s3806_s11 }
 0x39e   : > { %2018 = vrot.lane.b32.xlu1 %v4097_v30, %s3806_s11  ;;  %s3656_s11 = sshll.u32 %s5408_s16, 8 }
 0x3a0   : > { %2022 = vrot.lane.b32.xlu0 %v4093_v28, %s3807_s12 }
 0x3a2   : > { %2024 = vrot.lane.b32.xlu1 %v4097_v30, %s3807_s12 }
 0x3a4   : > { %2028 = vrot.lane.b32.xlu0 %v4093_v28, %s3808_s13 }
 0x3a6   : > { %2030 = vrot.lane.b32.xlu1 %v4097_v30, %s3808_s13 }
 0x3a8   : > { %2034 = vrot.lane.b32.xlu0 %v4093_v28, %s3809_s14 }
 0x3aa   : > { %2036 = vrot.lane.b32.xlu1 %v4097_v30, %s3809_s14  ;;  %s4184_s14 = scalar_lea.vmem %s5382_s1, %s3656_s11 }
 0x3ac   : > { %2040 = vrot.lane.b32.xlu0 %v4093_v28, %s3818_s29 }
 0x3ae   : > { %2042 = vrot.lane.b32.xlu1 %v4097_v30, %s3818_s29 }
 0x3b0   : > { %2046 = vrot.lane.b32.xlu0 %v4093_v28, %s3819_s30 }
 0x3b2   : > { %2048 = vrot.lane.b32.xlu1 %v4097_v30, %s3819_s30 }
 0x3b4   : > { %2052 = vrot.lane.b32.xlu0 %v4093_v28, %s3820_s5 }
 0x3b6   : > { %2054 = vrot.lane.b32.xlu1 %v4097_v30, %s3820_s5 }
 0x3b8   : > { %2058 = vrot.lane.b32.xlu0 %v4093_v28, %s3821_s6 }
 0x3ba   : > { %2060 = vrot.lane.b32.xlu1 %v4097_v30, %s3821_s6 }
 0x3bc   : > { %2064 = vrot.lane.b32.xlu0 %v4093_v28, %s3822_s7 }
 0x3be   : > { %2066 = vrot.lane.b32.xlu1 %v4097_v30, %s3822_s7 }
 0x3c0   : > { %2070 = vrot.lane.b32.xlu0 %v4093_v28, %s3823_s8 }
 0x3c2   : > { %2072 = vrot.lane.b32.xlu1 %v4097_v30, %s3823_s8 }
 0x3c4   : > { %2076 = vrot.lane.b32.xlu0 %v4093_v28, %s3824_s9 }
 0x3c6   : > { %2078 = vrot.lane.b32.xlu1 %v4097_v30, %s3824_s9 }
 0x3c8   : > { %2082 = vrot.lane.b32.xlu0 %v4093_v28, %s3825_s10 }
 0x3ca   : > { %2084 = vrot.lane.b32.xlu1 %v4097_v30, %s3825_s10 }
 0x402   : > { %v1999_v32 = vpop.permute.xlu0 %1998 }
 0x404   : > { %v2001_v34 = vpop.permute.xlu1 %2000 }
 0x406   : > { %v2005_v35 = vpop.permute.xlu0 %2004 }
 0x407   : > { %v2089_v36 = vcombine.high %v4093_v28, %v2005_v35  ;;  %v2088_v56 = vcombine.low %v4093_v28, %v2005_v35 }
 0x408   : > { %v2007_v37 = vpop.permute.xlu1 %2006 }
 0x409   : > { %v2361_v33 = vcombine.high %v4097_v30, %v2007_v37  ;;  %v2103_v41 = vrot.slane %v2089_v36, %v3866_v10  ;;  %v2360_v61 = vcombine.low %v4097_v30, %v2007_v37  ;;  %v2096_v2 = vrot.slane %v2088_v56, %v3866_v10  ;;  %v330_v37 = vld [vmem:[%s4184_s14] sm:$0xff] }
 0x40a   : > { %v2011_v38 = vpop.permute.xlu0 %2010 }
 0x40b   : > { %v2105_v39 = vcombine.high %v1999_v32, %v2011_v38  ;;  %v2104_v48 = vcombine.low %v1999_v32, %v2011_v38  ;;  %v2375_v57 = vrot.slane %v2361_v33, %v3866_v10  ;;  %v2368_v5 = vrot.slane %v2360_v61, %v3866_v10 }
 0x40c   : > { %v2013_v40 = vpop.permute.xlu1 %2012 }
 0x40d   : > { %v2119_v42 = vrot.slane %v2105_v39, %v3866_v10  ;;  %v2377_v43 = vcombine.high %v2001_v34, %v2013_v40  ;;  %v2376_v58 = vcombine.low %v2001_v34, %v2013_v40  ;;  %v2112_v62 = vrot.slane %v2104_v48, %v3866_v10 }
 0x40e   : > { %v2017_v49 = vpop.permute.xlu0 %2016 }
 0x40f   : > { %v2168_v50 = vcombine.low %v2103_v41, %v2119_v42  ;;  %v2169_v51 = vcombine.high %v2103_v41, %v2119_v42  ;;  %v2391_v59 = vrot.slane %v2377_v43, %v3866_v10  ;;  %v2384_v3 = vrot.slane %v2376_v58, %v3866_v10 }
 0x410   : > { %v2019_v60 = vpop.permute.xlu1 %2018  ;;  %v2152_v6 = vcombine.low %v2096_v2, %v2112_v62  ;;  %v2153_v7 = vcombine.high %v2096_v2, %v2112_v62 }
 0x411   : > { %v2440_v63 = vcombine.low %v2375_v57, %v2391_v59  ;;  %v2441_v0 = vcombine.high %v2375_v57, %v2391_v59  ;;  %v2424_v9 = vcombine.low %v2368_v5, %v2384_v3  ;;  %v4156_v15 = vrot.slane %v2168_v50, %v3894_v25 }
 0x412   : > { %v2023_v1 = vpop.permute.xlu0 %2022  ;;  %v2160_v17 = vrot.slane %v2152_v6, %v3894_v25  ;;  %v2167_v19 = vrot.slane %v2153_v7, %v3894_v25  ;;  %v2425_v45 = vcombine.high %v2368_v5, %v2384_v3  ;;  %v4159_v12 = vrot.slane %v2169_v51, %v3894_v25 }
 0x413   : > { %v4162_v18 = vrot.slane %v2424_v9, %v3894_v25  ;;  %v2448_v28 = vrot.slane %v2440_v63, %v3894_v25  ;;  %v2455_v29 = vrot.slane %v2441_v0, %v3894_v25 }
 0x414   : > { %v2025_v4 = vpop.permute.xlu1 %2024  ;;  %v4177_v27 = vrot.slane %v2425_v45, %v3894_v25 }
 0x416   : > { %v2029_v8 = vpop.permute.xlu0 %2028 }
 0x417   : > { %v2120_v44 = vcombine.low %v2017_v49, %v2029_v8  ;;  %v2121_v52 = vcombine.high %v2017_v49, %v2029_v8  ;;  %v4199_v49 = vpack.c.bf16 %v330_v37, %v330_v37 }
 0x418   : > { %v2031_v11 = vpop.permute.xlu1 %2030 }
 0x419   : > { %v2392_v46 = vcombine.low %v2019_v60, %v2031_v11  ;;  %v2128_v20 = vrot.slane %v2120_v44, %v3866_v10  ;;  %v2135_v47 = vrot.slane %v2121_v52, %v3866_v10  ;;  %v2393_v55 = vcombine.high %v2019_v60, %v2031_v11 }
 0x41a   : > { %v2035_v53 = vpop.permute.xlu0 %2034 }
 0x41b   : > { %v2136_v54 = vcombine.low %v2023_v1, %v2035_v53  ;;  %v2137_v13 = vcombine.high %v2023_v1, %v2035_v53  ;;  %v2400_v32 = vrot.slane %v2392_v46, %v3866_v10  ;;  %v2407_v33 = vrot.slane %v2393_v55, %v3866_v10 }
 0x41c   : > { %v2037_v14 = vpop.permute.xlu1 %2036 }
 0x41d   : > { %v2144_v16 = vrot.slane %v2136_v54, %v3866_v10  ;;  %v2151_v21 = vrot.slane %v2137_v13, %v3866_v10  ;;  %v2408_v22 = vcombine.low %v2025_v4, %v2037_v14  ;;  %v2409_v23 = vcombine.high %v2025_v4, %v2037_v14 }
 0x41e   : > { %v2041_v30 = vpop.permute.xlu0 %2040 }
 0x41f   : > { %v2184_v34 = vcombine.low %v2128_v20, %v2144_v16  ;;  %v2185_v35 = vcombine.high %v2128_v20, %v2144_v16  ;;  %v2200_v36 = vcombine.low %v2135_v47, %v2151_v21  ;;  %v2201_v38 = vcombine.high %v2135_v47, %v2151_v21 }
 0x420   : > { %v2416_v39 = vrot.slane %v2408_v22, %v3866_v10  ;;  %v2423_v40 = vrot.slane %v2409_v23, %v3866_v10  ;;  %v2043_v41 = vpop.permute.xlu1 %2042 }
 0x421   : > { %v2192_v42 = vrot.slane %v2184_v34, %v3894_v25  ;;  %v2199_v43 = vrot.slane %v2185_v35, %v3894_v25  ;;  %v4197_v48 = vrot.slane %v2200_v36, %v3894_v25  ;;  %v4202_v63 = vrot.slane %v2201_v38, %v3894_v25 }
 0x422   : > { %v2456_v50 = vcombine.low %v2400_v32, %v2416_v39  ;;  %v2457_v51 = vcombine.high %v2400_v32, %v2416_v39  ;;  %v2472_v56 = vcombine.low %v2407_v33, %v2423_v40  ;;  %v2473_v57 = vcombine.high %v2407_v33, %v2423_v40  ;;  %v2047_v58 = vpop.permute.xlu0 %2046 }
 0x423   : > { %v2216_v59 = vcombine.low %v2160_v17, %v2192_v42  ;;  %v2217_v60 = vcombine.high %v2160_v17, %v2192_v42  ;;  %v2218_v61 = vcombine.low %v2167_v19, %v2199_v43  ;;  %v2219_v62 = vcombine.high %v2167_v19, %v2199_v43 }
 0x424   : > { %v4205_v0 = vrot.slane %v2456_v50, %v3894_v25  ;;  %v2480_v1 = vrot.slane %v2472_v56, %v3894_v25  ;;  %v2487_v2 = vrot.slane %v2473_v57, %v3894_v25  ;;  %v2049_v3 = vpop.permute.xlu1 %2048  ;;  %v4210_v4 = vrot.slane %v2457_v51, %v3894_v25 }
 0x425   : > { %v3689_v5 = vpack.c.bf16 %v2216_v59, %v2216_v59  ;;  %v3691_v6 = vpack.c.bf16 %v2217_v60, %v2217_v60  ;;  %v3693_v7 = vpack.c.bf16 %v2218_v61, %v2218_v61  ;;  %v3695_v53 = vpack.c.bf16 %v2219_v62, %v2219_v62 }
 0x426   : > { %v2492_v8 = vcombine.low %v2448_v28, %v2480_v1  ;;  %v2493_v9 = vcombine.high %v2448_v28, %v2480_v1  ;;  %v2494_v44 = vcombine.low %v2455_v29, %v2487_v2  ;;  %v2495_v52 = vcombine.high %v2455_v29, %v2487_v2  ;;  %v2053_v11 = vpop.permute.xlu0 %2052 }
 0x427   : > { %v2224_v17 = vcombine.low %v2041_v30, %v2053_v11  ;;  %v2225_v19 = vcombine.high %v2041_v30, %v2053_v11  ;;  %v2729_v45 = vshrl.u32 %v3689_v5, 16  ;;  %v2732_v47 = vshll.u32 %v3689_v5, 16 }
 0x428   : > { %v4212_v46 = vpack.c.bf16 %v2492_v8, %v2492_v8  ;;  %v4214_v54 = vpack.c.bf16 %v2493_v9, %v2493_v9  ;;  %v4216_v13 = vpack.c.bf16 %v2494_v44, %v2494_v44  ;;  %v2055_v20 = vpop.permute.xlu1 %2054  ;;  %v4218_v55 = vpack.c.bf16 %v2495_v52, %v2495_v52 }
 0x429   : > { %v2232_v14 = vrot.slane %v2224_v17, %v3866_v10  ;;  %v2239_v16 = vrot.slane %v2225_v19, %v3866_v10  ;;  %v2496_v21 = vcombine.low %v2043_v41, %v2055_v20  ;;  %v2497_v22 = vcombine.high %v2043_v41, %v2055_v20 }
 0x42a   : > { %v2059_v23 = vpop.permute.xlu0 %2058  ;;  %v4222_v26 = vrot.slane %v2729_v45, 7  ;;  %v2746_v28 = vshrl.u32 %v3691_v6, 16  ;;  %v2763_v29 = vshrl.u32 %v3693_v7, 16  ;;  %v2749_v34 = vshll.u32 %v3691_v6, 16 }
 0x42b   : > { %v2504_v30 = vrot.slane %v2496_v21, %v3866_v10  ;;  %v2240_v31 = vcombine.low %v2047_v58, %v2059_v23  ;;  %v2241_v32 = vcombine.high %v2047_v58, %v2059_v23  ;;  %v2766_v38 = vshll.u32 %v3693_v7, 16 }
 0x42c   : > { %v2061_v35 = vpop.permute.xlu1 %2060  ;;  %v2734_v36 = vor.u32 %v2732_v47, %v4222_v26  ;;  %v4226_v37 = vrot.slane %v2746_v28, 7  ;;  %v4228_v33 = vrot.slane %v2763_v29, 7  ;;  %v2511_v43 = vrot.slane %v2497_v22, %v3866_v10 }
 0x42d   : > { %v2248_v39 = vrot.slane %v2240_v31, %v3866_v10  ;;  %v2255_v40 = vrot.slane %v2241_v32, %v3866_v10  ;;  %v2512_v41 = vcombine.low %v2049_v3, %v2061_v35  ;;  %v2513_v42 = vcombine.high %v2049_v3, %v2061_v35 }
 0x42e   : > { %3000 = vrot.lane.b32.xlu0 %v2734_v36, %s3795_s26  ;;  %v2751_v50 = vor.u32 %v2749_v34, %v4226_v37  ;;  %v2065_v51 = vpop.permute.xlu0 %2064  ;;  %v4236_v56 = vor.u32 %v2766_v38, %v4228_v33  ;;  %v2780_v57 = vshrl.u32 %v3695_v53, 16  ;;  %v2220_v5 = vcombine.low %v4156_v15, %v4197_v48 }
 0x42f   : > { %v2288_v58 = vcombine.low %v2232_v14, %v2248_v39  ;;  %v2289_v59 = vcombine.high %v2232_v14, %v2248_v39  ;;  %v2304_v60 = vcombine.low %v2239_v16, %v2255_v40  ;;  %v2305_v61 = vcombine.high %v2239_v16, %v2255_v40 }
 0x430   : > { %v2520_v62 = vrot.slane %v2512_v41, %v3866_v10  ;;  %v2527_v1 = vrot.slane %v2513_v42, %v3866_v10  ;;  %3006 = vrot.lane.b32.xlu1 %v2751_v50, %s3795_s26  ;;  %v2067_v2 = vpop.permute.xlu1 %2066  ;;  %v4241_v3 = vrot.slane %v2780_v57, 7  ;;  %v2783_v9 = vshll.u32 %v3695_v53, 16 }
 0x431   : > { %v4246_v6 = vrot.slane %v2288_v58, %v3894_v25  ;;  %v4249_v7 = vrot.slane %v2289_v59, %v3894_v25  ;;  %v4252_v8 = vrot.slane %v2304_v60, %v3894_v25  ;;  %v4255_v45 = vrot.slane %v2305_v61, %v3894_v25 }
 0x432   : > { %v2560_v44 = vcombine.low %v2504_v30, %v2520_v62  ;;  %v2561_v52 = vcombine.high %v2504_v30, %v2520_v62  ;;  %v2576_v11 = vcombine.low %v2511_v43, %v2527_v1  ;;  %v2577_v17 = vcombine.high %v2511_v43, %v2527_v1  ;;  %v2071_v19 = vpop.permute.xlu0 %2070 }
 0x433   : > { %v3697_v20 = vpack.c.bf16 %v2220_v5, %v2220_v5  ;;  %v2221_v47 = vcombine.high %v4156_v15, %v4197_v48  ;;  %v2222_v14 = vcombine.low %v4159_v12, %v4202_v63  ;;  %v4271_v23 = vor.u32 %v2783_v9, %v4241_v3 }
 0x434   : > { %v4262_v16 = vrot.slane %v2560_v44, %v3894_v25  ;;  %v4265_v53 = vrot.slane %v2561_v52, %v3894_v25  ;;  %v4268_v21 = vrot.slane %v2576_v11, %v3894_v25  ;;  %v2073_v22 = vpop.permute.xlu1 %2072  ;;  %v4274_v28 = vrot.slane %v2577_v17, %v3894_v25 }
 0x435   : > { %v2797_v15 = vshrl.u32 %v3697_v20, 16  ;;  %v3699_v48 = vpack.c.bf16 %v2221_v47, %v2221_v47  ;;  %v3701_v29 = vpack.c.bf16 %v2222_v14, %v2222_v14  ;;  %v2800_v31 = vshll.u32 %v3697_v20, 16 }
 0x436   : > { %v2077_v30 = vpop.permute.xlu0 %2076  ;;  %v2223_v32 = vcombine.high %v4159_v12, %v4202_v63  ;;  %v2752_v34 = vrot.slane %v4226_v37, 4  ;;  %v2735_v35 = vrot.slane %v4222_v26, 4  ;;  %v2786_v57 = vrot.slane %v4241_v3, 4 }
 0x437   : > { %v2256_v36 = vcombine.low %v2065_v51, %v2077_v30  ;;  %v2257_v38 = vcombine.high %v2065_v51, %v2077_v30  ;;  %v4280_v39 = vrot.slane %v2797_v15, 7  ;;  %v2814_v40 = vshrl.u32 %v3699_v48, 16 }
 0x438   : > { %v2079_v41 = vpop.permute.xlu1 %2078  ;;  %v2817_v42 = vshll.u32 %v3699_v48, 16  ;;  %v2831_v43 = vshrl.u32 %v3701_v29, 16  ;;  %v3703_v50 = vpack.c.bf16 %v2223_v32, %v2223_v32  ;;  %v2834_v12 = vshll.u32 %v3701_v29, 16 }
 0x439   : > { %v2264_v58 = vrot.slane %v2256_v36, %v3866_v10  ;;  %v2528_v59 = vcombine.low %v2067_v2, %v2079_v41  ;;  %v2529_v60 = vcombine.high %v2067_v2, %v2079_v41  ;;  %v2271_v63 = vrot.slane %v2257_v38, %v3866_v10 }
 0x43a   : > { %v2083_v61 = vpop.permute.xlu0 %2082  ;;  %v4285_v62 = vrot.slane %v2814_v40, 7  ;;  %v4287_v51 = vrot.slane %v2831_v43, 7  ;;  %v2848_v1 = vshrl.u32 %v3703_v50, 16  ;;  %v4291_v52 = vor.u32 %v2800_v31, %v4280_v39 }
 0x43b   : > { %v2536_v5 = vrot.slane %v2528_v59, %v3866_v10  ;;  %v2272_v9 = vcombine.low %v2071_v19, %v2083_v61  ;;  %v2273_v44 = vcombine.high %v2071_v19, %v2083_v61  ;;  %v2543_v11 = vrot.slane %v2529_v60, %v3866_v10 }
 0x43c   : > { %v2085_v17 = vpop.permute.xlu1 %2084  ;;  %v4295_v2 = vor.u32 %v2817_v42, %v4285_v62  ;;  %v4297_v20 = vrot.slane %v2848_v1, 7  ;;  %v2851_v47 = vshll.u32 %v3703_v50, 16  ;;  %v4302_v19 = vor.u32 %v2834_v12, %v4287_v51 }
 0x43d   : > { %v2280_v14 = vrot.slane %v2272_v9, %v3866_v10  ;;  %v2287_v15 = vrot.slane %v2273_v44, %v3866_v10  ;;  %v2544_v48 = vcombine.low %v2073_v22, %v2085_v17  ;;  %v2545_v29 = vcombine.high %v2073_v22, %v2085_v17 }
 0x43e   : > { %v4305_v30 = vor.u32 %v2851_v47, %v4297_v20 }
 0x43f   : > { %v2320_v36 = vcombine.low %v2264_v58, %v2280_v14  ;;  %v2321_v38 = vcombine.high %v2264_v58, %v2280_v14  ;;  %v2336_v40 = vcombine.low %v2271_v63, %v2287_v15  ;;  %v2337_v41 = vcombine.high %v2271_v63, %v2287_v15 }
 0x440   : > { %v2552_v42 = vrot.slane %v2544_v48, %v3866_v10  ;;  %v2559_v43 = vrot.slane %v2545_v29, %v3866_v10 }
 0x441   : > { %v2328_v59 = vrot.slane %v2320_v36, %v3894_v25  ;;  %v2335_v60 = vrot.slane %v2321_v38, %v3894_v25  ;;  %v2344_v12 = vrot.slane %v2336_v40, %v3894_v25  ;;  %v2351_v58 = vrot.slane %v2337_v41, %v3894_v25 }
 0x442   : > { %v2592_v1 = vcombine.low %v2536_v5, %v2552_v42  ;;  %v2608_v63 = vcombine.low %v2543_v11, %v2559_v43  ;;  %v2609_v9 = vcombine.high %v2543_v11, %v2559_v43  ;;  %v2593_v14 = vcombine.high %v2536_v5, %v2552_v42 }
 0x443   : > { %v2352_v44 = vcombine.low %v4246_v6, %v2328_v59  ;;  %v2353_v10 = vcombine.high %v4246_v6, %v2328_v59  ;;  %v2354_v17 = vcombine.low %v4249_v7, %v2335_v60  ;;  %v2355_v47 = vcombine.high %v4249_v7, %v2335_v60 }
 0x444   : > { %v4323_v15 = vrot.slane %v2592_v1, %v3894_v25  ;;  %v2616_v48 = vrot.slane %v2608_v63, %v3894_v25  ;;  %v2623_v29 = vrot.slane %v2609_v9, %v3894_v25  ;;  %v4332_v1 = vrot.slane %v2593_v14, %v3894_v25 }
 0x445   : > { %v3690_v36 = vpack.c.bf16 %v2352_v44, %v2352_v44  ;;  %v3692_v38 = vpack.c.bf16 %v2353_v10, %v2353_v10  ;;  %v3694_v11 = vpack.c.bf16 %v2354_v17, %v2354_v17  ;;  %v3696_v40 = vpack.c.bf16 %v2355_v47, %v2355_v47 }
 0x446   : > { %v2628_v41 = vcombine.low %v4268_v21, %v2616_v48  ;;  %v2629_v6 = vcombine.high %v4268_v21, %v2616_v48  ;;  %v2630_v43 = vcombine.low %v4274_v28, %v2623_v29  ;;  %v2631_v7 = vcombine.high %v4274_v28, %v2623_v29 }
 0x447   : > { %v2737_v5 = vshrl.u32 %v3690_v36, 16  ;;  %v2754_v42 = vshrl.u32 %v3692_v38, 16  ;;  %v2771_v59 = vshrl.u32 %v3694_v11, 16  ;;  %v2788_v60 = vshrl.u32 %v3696_v40, 16 }
 0x448   : > { %v4334_v63 = vpack.c.bf16 %v2628_v41, %v2628_v41  ;;  %v4336_v9 = vpack.c.bf16 %v2629_v6, %v2629_v6  ;;  %v4338_v44 = vpack.c.bf16 %v2630_v43, %v2630_v43  ;;  %v4340_v10 = vpack.c.bf16 %v2631_v7, %v2631_v7 }
 0x449   : > { %v2739_v21 = vrot.slane %v2737_v5, 7  ;;  %v2756_v17 = vrot.slane %v2754_v42, 7  ;;  %v2773_v47 = vrot.slane %v2771_v59, 7  ;;  %v2356_v28 = vcombine.low %v4252_v8, %v2344_v12 }
 0x44a   : > { %v2357_v48 = vcombine.high %v4252_v8, %v2344_v12  ;;  %v2358_v29 = vcombine.low %v4255_v45, %v2351_v58  ;;  %v2359_v25 = vcombine.high %v4255_v45, %v2351_v58  ;;  %v2790_v6 = vrot.slane %v2788_v60, 7 }
 0x44b   : > { %v2744_v14 = vrot.slane %v2739_v21, 4  ;;  %v2761_v41 = vrot.slane %v2756_v17, 4  ;;  %v2778_v61 = vrot.slane %v2773_v47, 4  ;;  %v3698_v50 = vpack.c.bf16 %v2356_v28, %v2356_v28 }
 0x44c   : > { %v3700_v43 = vpack.c.bf16 %v2357_v48, %v2357_v48  ;;  %v3702_v22 = vpack.c.bf16 %v2358_v29, %v2358_v29  ;;  %v3704_v7 = vpack.c.bf16 %v2359_v25, %v2359_v25  ;;  %v2757_v5 = vshll.u32 %v3692_v38, 16 }
 0x44d   : > { %3004 = vrot.lane.b32.xlu0 %v2744_v14, %s3795_s26  ;;  %3010 = vrot.lane.b32.xlu1 %v2761_v41, %s3795_s26  ;;  %v2740_v42 = vshll.u32 %v3690_v36, 16  ;;  %v2791_v59 = vshll.u32 %v3696_v40, 16  ;;  %v2774_v8 = vshll.u32 %v3694_v11, 16  ;;  %v2805_v12 = vshrl.u32 %v3698_v50, 16 }
 0x44e   : > { %v2822_v32 = vshrl.u32 %v3700_v43, 16  ;;  %v2839_v31 = vshrl.u32 %v3702_v22, 16  ;;  %v2856_v45 = vshrl.u32 %v3704_v7, 16  ;;  %v2759_v60 = vor.u32 %v2757_v5, %v2756_v17 }
 0x44f   : > { %v2742_v28 = vor.u32 %v2740_v42, %v2739_v21  ;;  %v2793_v48 = vor.u32 %v2791_v59, %v2790_v6  ;;  %v2776_v29 = vor.u32 %v2774_v8, %v2773_v47  ;;  %v2795_v25 = vrot.slane %v2790_v6, 4 }
 0x450   : > { %v2807_v14 = vrot.slane %v2805_v12, 7  ;;  %v2824_v38 = vrot.slane %v2822_v32, 7  ;;  %v4354_v36 = vrot.slane %v2839_v31, 7  ;;  %v4360_v11 = vrot.slane %v2856_v45, 7 }
 0x451   : > { %3012 = vrot.lane.b32.xlu0 %v4236_v56, %s3795_s26  ;;  %3018 = vrot.lane.b32.xlu1 %v4271_v23, %s3795_s26  ;;  %v4366_v40 = vsel %vm4350_vm7, %v2752_v34, %v2759_v60  ;;  %v4372_v31 = vsel %vm4350_vm7, %v2735_v35, %v2742_v28  ;;  %v2825_v32 = vshll.u32 %v3700_v43, 16  ;;  %v4379_v37 = vsel %vm4350_vm7, %v2786_v57, %v2793_v48 }
 0x452   : > { %v2812_v21 = vrot.slane %v2807_v14, 4  ;;  %v2829_v56 = vrot.slane %v2824_v38, 4  ;;  %v2846_v17 = vrot.slane %v4354_v36, 4  ;;  %v5390_v23 = vrot.slane %v4228_v33, 4 }
 0x453   : > { %v2827_v34 = vor.u32 %v2825_v32, %v2824_v38  ;;  %v2808_v35 = vshll.u32 %v3698_v50, 16  ;;  %v2842_v47 = vshll.u32 %v3702_v22, 16  ;;  %v2859_v41 = vshll.u32 %v3704_v7, 16 }
 0x454   : > { %v4385_v26 = vsel %vm4350_vm7, %v5390_v23, %v2776_v29  ;;  %v2488_v6 = vcombine.low %v4162_v18, %v4205_v0  ;;  %v2624_v3 = vcombine.low %v4262_v16, %v4323_v15  ;;  %v2489_v57 = vcombine.high %v4162_v18, %v4205_v0 }
 0x455   : > { %3016 = vrot.lane.b32.xlu0 %v2778_v61, %s3795_s26  ;;  %3022 = vrot.lane.b32.xlu1 %v2795_v25, %s3795_s26  ;;  %v2863_v33 = vrot.slane %v4360_v11, 4  ;;  %v5391_v43 = vrot.slane %v4285_v62, 4  ;;  %v2810_v50 = vor.u32 %v2808_v35, %v2807_v14  ;;  %v2844_v7 = vor.u32 %v2842_v47, %v4354_v36 }
 0x456   : > { %v2861_v5 = vor.u32 %v2859_v41, %v4360_v11  ;;  %v3705_v42 = vpack.c.bf16 %v2488_v6, %v2488_v6  ;;  %v4404_v59 = vpack.c.bf16 %v2624_v3, %v2624_v3  ;;  %v3707_v18 = vpack.c.bf16 %v2489_v57, %v2489_v57 }
 0x457   : > { %v4400_v22 = vsel %vm4350_vm7, %v5391_v43, %v2827_v34  ;;  %v5392_v0 = vrot.slane %v4280_v39, 4  ;;  %v2625_v62 = vcombine.high %v4262_v16, %v4323_v15  ;;  %v2490_v8 = vcombine.low %v4177_v27, %v4210_v4 }
 0x458   : > { %v2933_v12 = vshrl.u32 %v4212_v46, 16  ;;  %v5393_v45 = vrot.slane %v4287_v51, 4  ;;  %v5394_v39 = vrot.slane %v4297_v20, 4  ;;  %v2865_v48 = vshrl.u32 %v3705_v42, 16 }
 0x459   : > { %v4410_v61 = vsel %vm4350_vm7, %v5392_v0, %v2810_v50  ;;  %v2873_v16 = vshrl.u32 %v4404_v59, 16  ;;  %3024 = vrot.lane.b32.xlu0 %v4291_v52, %s3795_s26  ;;  %3030 = vrot.lane.b32.xlu1 %v4295_v2, %s3795_s26  ;;  %v2868_v51 = vshll.u32 %v3705_v42, 16  ;;  %v2882_v15 = vshrl.u32 %v3707_v18, 16 }
 0x45a   : > { %v4421_v60 = vsel %vm4350_vm7, %v5393_v45, %v2844_v7  ;;  %v4427_v28 = vsel %vm4350_vm7, %v5394_v39, %v2861_v5  ;;  %v4434_v29 = vpack.c.bf16 %v2625_v62, %v2625_v62  ;;  %v3709_v25 = vpack.c.bf16 %v2490_v8, %v2490_v8 }
 0x45b   : > { %v4436_v14 = vrot.slane %v2865_v48, 7  ;;  %v4438_v20 = vrot.slane %v2873_v16, 7  ;;  %v2626_v38 = vcombine.low %v4265_v53, %v4332_v1  ;;  %v2491_v32 = vcombine.high %v4177_v27, %v4210_v4 }
 0x45c   : > { %v4444_v23 = vrot.slane %v2882_v15, 7  ;;  %v2885_v52 = vshll.u32 %v3707_v18, 16  ;;  %v2890_v2 = vshrl.u32 %v4434_v29, 16  ;;  %v2899_v34 = vshrl.u32 %v3709_v25, 16 }
 0x45d   : > { %v4448_v35 = vor.u32 %v2868_v51, %v4436_v14  ;;  %v2902_v47 = vshll.u32 %v3709_v25, 16  ;;  %v4450_v41 = vpack.c.bf16 %v2626_v38, %v2626_v38  ;;  %v3711_v6 = vpack.c.bf16 %v2491_v32, %v2491_v32  ;;  %3028 = vrot.lane.b32.xlu0 %v2812_v21, %s3795_s26  ;;  %3034 = vrot.lane.b32.xlu1 %v2829_v56, %s3795_s26 }
 0x45e   : > { %v2880_v3 = vrot.slane %v4438_v20, 4  ;;  %v4455_v27 = vrot.slane %v2890_v2, 7  ;;  %v4457_v4 = vrot.slane %v2899_v34, 7  ;;  %v2627_v57 = vcombine.high %v4265_v53, %v4332_v1 }
 0x45f   : > { %v4462_v43 = vor.u32 %v2885_v52, %v4444_v23  ;;  %v2907_v50 = vshrl.u32 %v4450_v41, 16  ;;  %v2916_v7 = vshrl.u32 %v3711_v6, 16  ;;  %v4465_v5 = vrot.slane %v2933_v12, 7 }
 0x460   : > { %v2897_v21 = vrot.slane %v4455_v27, 4  ;;  %v2919_v56 = vshll.u32 %v3711_v6, 16  ;;  %v3712_v42 = vpack.c.bf16 %v2627_v57, %v2627_v57  ;;  %v2936_v18 = vshll.u32 %v4212_v46, 16 }
 0x461   : > { %v4469_v0 = vrot.slane %v2907_v50, 7  ;;  %v4471_v62 = vrot.slane %v2916_v7, 7  ;;  %v2941_v53 = vshrl.u32 %v4334_v63, 16  ;;  %v2950_v1 = vshrl.u32 %v4214_v54, 16  ;;  %3036 = vrot.lane.b32.xlu0 %v4302_v19, %s3795_s26  ;;  %3040 = vrot.lane.b32.xlu1 %v2846_v17, %s3795_s26 }
 0x462   : > { %v4481_v8 = vor.u32 %v2902_v47, %v4457_v4  ;;  %v2924_v12 = vshrl.u32 %v3712_v42, 16  ;;  %v4484_v46 = vor.u32 %v2936_v18, %v4465_v5  ;;  %v2958_v45 = vshrl.u32 %v4336_v9, 16 }
 0x463   : > { %v2914_v39 = vrot.slane %v4469_v0, 4  ;;  %v4488_v48 = vrot.slane %v2941_v53, 7  ;;  %v4490_v16 = vrot.slane %v2950_v1, 7  ;;  %v2953_v19 = vshll.u32 %v4214_v54, 16  ;;  %v3343_v1 = vld [vmem:[%s3871_s24 + $0x18] sm:$0x1] }
 0x464   : > { %v4494_v36 = vor.u32 %v2919_v56, %v4471_v62  ;;  %v4496_v17 = vrot.slane %v2924_v12, 7  ;;  %v4498_v51 = vrot.slane %v2958_v45, 7  ;;  %v2967_v15 = vshrl.u32 %v4216_v13, 16  ;;  %v332_v45 = vld [vmem:[%s4184_s14 + $0x10] sm:$0xff]  ;;  %v343_v56 = vld [vmem:[%s4184_s14 + $0x68] sm:$0xff] }
 0x465   : > { %v2948_v25 = vrot.slane %v4488_v48, 4  ;;  %v2970_v38 = vshll.u32 %v4216_v13, 16  ;;  %v2975_v32 = vshrl.u32 %v4338_v44, 16  ;;  %v2984_v52 = vshrl.u32 %v4218_v55, 16  ;;  %3042 = vrot.lane.b32.xlu0 %v4305_v30, %s3795_s26  ;;  %3046 = vrot.lane.b32.xlu1 %v2863_v33, %s3795_s26 }
 0x466   : > { %v2931_v54 = vrot.slane %v4496_v17, 4  ;;  %v4512_v2 = vor.u32 %v2953_v19, %v4490_v16  ;;  %v2965_v34 = vrot.slane %v4498_v51, 4  ;;  %v4515_v13 = vrot.slane %v2967_v15, 7 }
 0x467   : > { %v4517_v47 = vrot.slane %v2975_v32, 7  ;;  %v4519_v6 = vrot.slane %v2984_v52, 7  ;;  %v2987_v30 = vshll.u32 %v4218_v55, 16  ;;  %v2992_v57 = vshrl.u32 %v4340_v10, 16 }
 0x468   : > { %v4524_v11 = vor.u32 %v2970_v38, %v4515_v13  ;;  %v2888_v33 = vrot.slane %v4444_v23, 4  ;;  %v2893_v50 = vshll.u32 %v4434_v29, 16  ;;  %v2876_v7 = vshll.u32 %v4404_v59, 16 }
 0x469   : > { %v4531_v18 = vor.u32 %v2987_v30, %v4519_v6  ;;  %v4533_v53 = vrot.slane %v2992_v57, 7  ;;  %v2871_v55 = vrot.slane %v4436_v14, 4  ;;  %3008 = vrot.lane.b32.xlu0 %v4366_v40, %s3795_s26  ;;  %3002 = vrot.lane.b32.xlu1 %v4372_v31, %s3795_s26  ;;  %v2922_v23 = vrot.slane %v4471_v62, 4  ;;  %v3437_v57 = vld [vmem:[%s3871_s24 + $0xc] sm:$0xf] }
 0x46a   : > { %v2895_v29 = vor.u32 %v2893_v50, %v4455_v27  ;;  %v2878_v59 = vor.u32 %v2876_v7, %v4438_v20  ;;  %v2927_v12 = vshll.u32 %v3712_v42, 16  ;;  %v2905_v19 = vrot.slane %v4457_v4, 4 }
 0x46b   : > { %v2910_v14 = vshll.u32 %v4450_v41, 16  ;;  %v461_v15 = vshrl.u32 %v4199_v49, 16  ;;  %v464_v40 = vshll.u32 %v4199_v49, 16  ;;  %v236_v42 = vsel %vm4171_vm5, 0, %v3343_v1 }
 0x46c   : > { %v4552_v38 = vsel %vm4350_vm7, %v2888_v33, %v2895_v29  ;;  %v2929_v32 = vor.u32 %v2927_v12, %v4496_v17  ;;  %v4559_v4 = vsel %vm4350_vm7, %v2871_v55, %v2878_v59  ;;  %3344 = vst [vmem:[%s3871_s24 + $0x18] sm:$0x1] %v236_v42  ;;  %v3659_v49 = vpack.c.bf16 %v332_v45, %v332_v45  ;;  %v3375_v12 = vld [vmem:[%s3871_s24 + $0x20] sm:$0x1] }
 0x46d   : > { %v2912_v41 = vor.u32 %v2910_v14, %v4469_v0  ;;  %v4562_v62 = vrot.slane %v461_v15, 7  ;;  %3020 = vrot.lane.b32.xlu0 %v4379_v37, %s3795_s26  ;;  %3014 = vrot.lane.b32.xlu1 %v4385_v26, %s3795_s26  ;;  %v2956_v33 = vrot.slane %v4490_v16, 4  ;;  %v2961_v37 = vshll.u32 %v4336_v9, 16  ;;  %v3373_v16 = vld [vmem:[%s3871_s24 + $0x14] sm:$0x1] }
 0x46e   : > { %v4571_v52 = vsel %vm4350_vm7, %v2922_v23, %v2929_v32  ;;  %v2944_v50 = vshll.u32 %v4334_v63, 16  ;;  %v478_v7 = vshrl.u32 %v3659_v49, 16  ;;  %v481_v55 = vshll.u32 %v3659_v49, 16  ;;  %v3345_v32 = vld [vmem:[%s3871_s24 + $0x24] sm:$0x1] }
 0x46f   : > { %v466_v26 = vor.u32 %v464_v40, %v4562_v62  ;;  %v2939_v1 = vrot.slane %v4465_v5, 4  ;;  %v4594_v9 = vsel %vm4350_vm7, %v2905_v19, %v2912_v41  ;;  %v2963_v63 = vor.u32 %v2961_v37, %v4498_v51  ;;  %v331_v5 = vld [vmem:[%s4184_s14 + $0x8] sm:$0xff]  ;;  %v333_v40 = vld [vmem:[%s4184_s14 + $0x18] sm:$0xff]  ;;  %v334_v41 = vld [vmem:[%s4184_s14 + $0x20] sm:$0xff] }
 0x470   : > { %v2946_v59 = vor.u32 %v2944_v50, %v4488_v48  ;;  %v2995_v23 = vshll.u32 %v4340_v10, 16  ;;  %v4603_v14 = vrot.slane %v478_v7, 7  ;;  %v2990_v15 = vrot.slane %v4519_v6, 4  ;;  %v336_v37 = vld [vmem:[%s4184_s14 + $0x30] sm:$0xff]  ;;  %v335_v50 = vld [vmem:[%s4184_s14 + $0x28] sm:$0xff] }
 0x471   : > { %v783_v45 = vsel %vm4575_vm10, %v466_v26, %v3437_v57  ;;  %v2978_v19 = vshll.u32 %v4338_v44, 16  ;;  %3032 = vrot.lane.b32.xlu0 %v4400_v22, %s3795_s26  ;;  %3026 = vrot.lane.b32.xlu1 %v4410_v61, %s3795_s26  ;;  %v4616_v10 = vsel %vm4350_vm7, %v2956_v33, %v2963_v63  ;;  %v2973_v44 = vrot.slane %v4515_v13, 4  ;;  %v3347_v22 = vld [vmem:[%s3871_s24 + $0x30] sm:$0x1]  ;;  %v3377_v13 = vld [vmem:[%s3871_s24 + $0x2c] sm:$0x1] }
 0x472   : > { %3438 = vst [vmem:[%s3871_s24 + $0xc] sm:$0xf] %v783_v45  ;;  %v2997_v6 = vor.u32 %v2995_v23, %v4533_v53  ;;  %v283_v42 = vsel %vm4587_vm11, 0, %v3373_v16  ;;  %v483_v49 = vor.u32 %v481_v55, %v4603_v14  ;;  %v4627_v61 = vsel %vm4350_vm7, %v2939_v1, %v2946_v59  ;;  %v3379_v16 = vld [vmem:[%s3871_s24 + $0x38] sm:$0x1] }
 0x473   : > { %v2980_v57 = vor.u32 %v2978_v19, %v4517_v47  ;;  %3374 = vst [vmem:[%s3871_s24 + $0x14] sm:$0x1] %v283_v42  ;;  %v4631_v33 = vpack.c.bf16 %v331_v5, %v331_v5  ;;  %v3442_v26 = vld [vmem:[%s3871_s24 + $0x18] sm:$0xf]  ;;  %v286_v55 = vsel %vm4587_vm11, 0, %v3375_v12  ;;  %v4643_v1 = vpack.c.bf16 %v333_v40, %v333_v40  ;;  %v338_v42 = vld [vmem:[%s4184_s14 + $0x40] sm:$0xff] }
 0x474   : > { %v4639_v7 = vsel %vm4350_vm7, %v2990_v15, %v2997_v6  ;;  %v793_v63 = vsel %vm4575_vm10, %v483_v49, %v3442_v26  ;;  %3376 = vst [vmem:[%s3871_s24 + $0x20] sm:$0x1] %v286_v55  ;;  %v239_v5 = vsel %vm4171_vm5, 0, %v3345_v32  ;;  %v3661_v45 = vpack.c.bf16 %v334_v41, %v334_v41  ;;  %v337_v40 = vld [vmem:[%s4184_s14 + $0x38] sm:$0xff] }
 0x475   : > { %v4650_v59 = vsel %vm4350_vm7, %v2973_v44, %v2980_v57  ;;  %v469_v23 = vshrl.u32 %v4631_v33, 16  ;;  %3038 = vrot.lane.b32.xlu0 %v4421_v60, %s3795_s26  ;;  %3044 = vrot.lane.b32.xlu1 %v4427_v28, %s3795_s26  ;;  %3443 = vst [vmem:[%s3871_s24 + $0x18] sm:$0xf] %v793_v63  ;;  %v486_v12 = vshrl.u32 %v4643_v1, 16  ;;  %3346 = vst [vmem:[%s3871_s24 + $0x24] sm:$0x1] %v239_v5 }
 0x476   : > { %v242_v15 = vsel %vm4171_vm5, 0, %v3347_v22  ;;  %v3663_v19 = vpack.c.bf16 %v336_v37, %v336_v37  ;;  %v289_v60 = vsel %vm4587_vm11, 0, %v3377_v13  ;;  %v4671_v28 = vpack.c.bf16 %v335_v50, %v335_v50  ;;  %v3349_v44 = vld [vmem:[%s3871_s24 + $0x3c] sm:$0x1]  ;;  %v3351_v13 = vld [vmem:[%s3871_s24 + $0x48] sm:$0x1] }
 0x477   : > { %v4666_v32 = vrot.slane %v469_v23, 7  ;;  %3348 = vst [vmem:[%s3871_s24 + $0x30] sm:$0x1] %v242_v15  ;;  %v292_v6 = vsel %vm4587_vm11, 0, %v3379_v16  ;;  %v4683_v22 = vrot.slane %v486_v12, 7  ;;  %v495_v49 = vshrl.u32 %v3661_v45, 16 }
 0x478   : > { %v498_v57 = vshll.u32 %v3661_v45, 16  ;;  %v512_v37 = vshrl.u32 %v3663_v19, 16  ;;  %3378 = vst [vmem:[%s3871_s24 + $0x2c] sm:$0x1] %v289_v60  ;;  %3380 = vst [vmem:[%s3871_s24 + $0x38] sm:$0x1] %v292_v6  ;;  %v4690_v16 = vpack.c.bf16 %v337_v40, %v337_v40 }
 0x479   : > { %v476_v50 = vrot.slane %v4666_v32, 4  ;;  %v515_v26 = vshll.u32 %v3663_v19, 16  ;;  %v503_v55 = vshrl.u32 %v4671_v28, 16  ;;  %v340_v63 = vld [vmem:[%s4184_s14 + $0x50] sm:$0xff]  ;;  %v339_v23 = vld [vmem:[%s4184_s14 + $0x48] sm:$0xff]  ;;  %3048 = vrot.lane.b32.xlu0 %v4448_v35, %s3795_s26  ;;  %3052 = vrot.lane.b32.xlu1 %v2880_v3, %s3795_s26  ;;  %v493_v12 = vrot.slane %v4683_v22, 4 }
 0x47a   : > { %v3440_v5 = vld [vmem:[%s3871_s24 + $0x14] sm:$0x1]  ;;  %v4701_v45 = vrot.slane %v495_v49, 7  ;;  %v4703_v15 = vrot.slane %v512_v37, 7  ;;  %v245_v19 = vsel %vm4171_vm5, 0, %v3349_v44  ;;  %v520_v20 = vshrl.u32 %v4690_v16, 16 }
 0x47b   : > { %v790_v35 = vsel %vm4679_vm12, %v476_v50, %v3440_v5  ;;  %v4709_v40 = vrot.slane %v503_v55, 7  ;;  %3350 = vst [vmem:[%s3871_s24 + $0x3c] sm:$0x1] %v245_v19  ;;  %v3665_v3 = vpack.c.bf16 %v338_v42, %v338_v42  ;;  %v3381_v60 = vld [vmem:[%s3871_s24 + $0x44] sm:$0x1]  ;;  %v248_v37 = vsel %vm4171_vm5, 0, %v3351_v13 }
 0x47c   : > { %3441 = vst [vmem:[%s3871_s24 + $0x14] sm:$0x1] %v790_v35  ;;  %v3445_v6 = vld [vmem:[%s3871_s24 + $0x20] sm:$0x1]  ;;  %v500_v49 = vor.u32 %v498_v57, %v4701_v45  ;;  %v517_v44 = vor.u32 %v515_v26, %v4703_v15  ;;  %v3667_v50 = vpack.c.bf16 %v340_v63, %v340_v63  ;;  %v3383_v55 = vld [vmem:[%s3871_s24 + $0x50] sm:$0x1]  ;;  %v4729_v57 = vpack.c.bf16 %v339_v23, %v339_v23 }
 0x47d   : > { %v341_v5 = vld [vmem:[%s4184_s14 + $0x58] sm:$0xff]  ;;  %v797_v42 = vsel %vm4679_vm12, %v493_v12, %v3445_v6  ;;  %v3447_v19 = vld [vmem:[%s3871_s24 + $0x24] sm:$0xf]  ;;  %v510_v35 = vrot.slane %v4709_v40, 4  ;;  %v4726_v31 = vrot.slane %v520_v20, 7  ;;  %3054 = vrot.lane.b32.xlu0 %v4462_v43, %s3795_s26  ;;  %3058 = vrot.lane.b32.xlu1 %v2897_v21, %s3795_s26  ;;  %v529_v12 = vshrl.u32 %v3665_v3, 16 }
 0x47e   : > { %3352 = vst [vmem:[%s3871_s24 + $0x48] sm:$0x1] %v248_v37  ;;  %v3353_v26 = vld [vmem:[%s3871_s24 + $0x54] sm:$0x1]  ;;  %3446 = vst [vmem:[%s3871_s24 + $0x20] sm:$0x1] %v797_v42  ;;  %v800_v13 = vsel %vm4575_vm10, %v500_v49, %v3447_v19  ;;  %v4748_v49 = vpack.c.bf16 %v341_v5, %v341_v5 }
 0x47f   : > { %v3452_v63 = vld [vmem:[%s3871_s24 + $0x30] sm:$0xf]  ;;  %v532_v20 = vshll.u32 %v3665_v3, 16  ;;  %v546_v23 = vshrl.u32 %v3667_v50, 16  ;;  %v342_v6 = vld [vmem:[%s4184_s14 + $0x60] sm:$0xff]  ;;  %v527_v21 = vrot.slane %v4726_v31, 4 }
 0x480   : > { %3448 = vst [vmem:[%s3871_s24 + $0x24] sm:$0xf] %v800_v13  ;;  %v807_v43 = vsel %vm4575_vm10, %v517_v44, %v3452_v63  ;;  %v3450_v27 = vld [vmem:[%s3871_s24 + $0x2c] sm:$0x1]  ;;  %v3455_v37 = vld [vmem:[%s3871_s24 + $0x38] sm:$0x1] }
 0x481   : > { %v549_v42 = vshll.u32 %v3667_v50, 16  ;;  %3453 = vst [vmem:[%s3871_s24 + $0x30] sm:$0xf] %v807_v43  ;;  %v804_v3 = vsel %vm4679_vm12, %v510_v35, %v3450_v27  ;;  %v4753_v19 = vrot.slane %v529_v12, 7  ;;  %v4755_v13 = vrot.slane %v546_v23, 7  ;;  %3060 = vrot.lane.b32.xlu0 %v4481_v8, %s3795_s26  ;;  %3064 = vrot.lane.b32.xlu1 %v2914_v39, %s3795_s26  ;;  %v344_v8 = vld [vmem:[%s4184_s14 + $0x70] sm:$0xff] }
 0x482   : > { %v295_v44 = vsel %vm4587_vm11, 0, %v3381_v60  ;;  %v3385_v63 = vld [vmem:[%s3871_s24 + $0x5c] sm:$0x1]  ;;  %3451 = vst [vmem:[%s3871_s24 + $0x2c] sm:$0x1] %v804_v3  ;;  %v811_v50 = vsel %vm4679_vm12, %v527_v21, %v3455_v37  ;;  %v537_v5 = vshrl.u32 %v4729_v57, 16  ;;  %v3669_v21 = vpack.c.bf16 %v342_v6, %v342_v6 }
 0x483   : > { %3382 = vst [vmem:[%s3871_s24 + $0x44] sm:$0x1] %v295_v44  ;;  %v298_v35 = vsel %vm4587_vm11, 0, %v3383_v55  ;;  %v554_v12 = vshrl.u32 %v4748_v49, 16  ;;  %v3355_v23 = vld [vmem:[%s3871_s24 + $0x60] sm:$0x1]  ;;  %v534_v60 = vor.u32 %v532_v20, %v4753_v19  ;;  %v551_v27 = vor.u32 %v549_v42, %v4755_v13 }
 0x484   : > { %3456 = vst [vmem:[%s3871_s24 + $0x38] sm:$0x1] %v811_v50  ;;  %v3457_v43 = vld [vmem:[%s3871_s24 + $0x3c] sm:$0xf]  ;;  %3384 = vst [vmem:[%s3871_s24 + $0x50] sm:$0x1] %v298_v35  ;;  %v4790_v20 = vpack.c.bf16 %v343_v56, %v343_v56 }
 0x485   : > { %v251_v55 = vsel %vm4171_vm5, 0, %v3353_v26  ;;  %v4783_v37 = vrot.slane %v537_v5, 7  ;;  %v4785_v0 = vrot.slane %v554_v12, 7  ;;  %v301_v39 = vsel %vm4587_vm11, 0, %v3385_v63  ;;  %v3387_v42 = vld [vmem:[%s3871_s24 + $0x68] sm:$0x1]  ;;  %3066 = vrot.lane.b32.xlu0 %v4494_v36, %s3795_s26  ;;  %3070 = vrot.lane.b32.xlu1 %v2931_v54, %s3795_s26 }
 0x486   : > { %3354 = vst [vmem:[%s3871_s24 + $0x54] sm:$0x1] %v251_v55  ;;  %v345_v3 = vld [vmem:[%s4184_s14 + $0x78] sm:$0xff]  ;;  %v814_v26 = vsel %vm4575_vm10, %v534_v60, %v3457_v43  ;;  %v3462_v6 = vld [vmem:[%s3871_s24 + $0x48] sm:$0xf]  ;;  %v563_v44 = vshrl.u32 %v3669_v21, 16  ;;  %v3671_v43 = vpack.c.bf16 %v344_v8, %v344_v8 }
 0x487   : > { %v566_v50 = vshll.u32 %v3669_v21, 16  ;;  %3386 = vst [vmem:[%s3871_s24 + $0x5c] sm:$0x1] %v301_v39  ;;  %v254_v5 = vsel %vm4171_vm5, 0, %v3355_v23  ;;  %3458 = vst [vmem:[%s3871_s24 + $0x3c] sm:$0xf] %v814_v26  ;;  %v821_v63 = vsel %vm4575_vm10, %v551_v27, %v3462_v6  ;;  %v4818_v55 = vpack.c.bf16 %v345_v3, %v345_v3 }
 0x488   : > { %v544_v56 = vrot.slane %v4783_v37, 4  ;;  %v561_v35 = vrot.slane %v4785_v0, 4  ;;  %v571_v12 = vshrl.u32 %v4790_v20, 16  ;;  %3356 = vst [vmem:[%s3871_s24 + $0x60] sm:$0x1] %v254_v5  ;;  %v346_v60 = vld [vmem:[%s4184_s14 + $0x80] sm:$0xff] }
 0x489   : > { %3463 = vst [vmem:[%s3871_s24 + $0x48] sm:$0xf] %v821_v63  ;;  %v4814_v23 = vrot.slane %v563_v44, 7  ;;  %v304_v27 = vsel %vm4587_vm11, 0, %v3387_v42  ;;  %v484_v36 = vrot.slane %v4603_v14, 4  ;;  %v489_v39 = vshll.u32 %v4643_v1, 16  ;;  %3072 = vrot.lane.b32.xlu0 %v4484_v46, %s3795_s26  ;;  %3076 = vrot.lane.b32.xlu1 %v2948_v25, %s3795_s26 }
 0x48a   : > { %v4820_v21 = vrot.slane %v571_v12, 7  ;;  %3388 = vst [vmem:[%s3871_s24 + $0x68] sm:$0x1] %v304_v27  ;;  %v467_v17 = vrot.slane %v4562_v62, 4  ;;  %v3460_v54 = vld [vmem:[%s3871_s24 + $0x44] sm:$0x1]  ;;  %v4828_v42 = vpack.c.bf16 %v346_v60, %v346_v60 }
 0x48b   : > { %v568_v26 = vor.u32 %v566_v50, %v4814_v23  ;;  %v580_v8 = vshrl.u32 %v3671_v43, 16  ;;  %v583_v6 = vshll.u32 %v3671_v43, 16  ;;  %v818_v3 = vsel %vm4679_vm12, %v544_v56, %v3460_v54  ;;  %v3465_v44 = vld [vmem:[%s3871_s24 + $0x50] sm:$0x1] }
 0x48c   : > { %v578_v14 = vrot.slane %v4820_v21, 4  ;;  %v588_v1 = vshrl.u32 %v4818_v55, 16  ;;  %v491_v62 = vor.u32 %v489_v39, %v4683_v22  ;;  %3461 = vst [vmem:[%s3871_s24 + $0x44] sm:$0x1] %v818_v3  ;;  %v825_v50 = vsel %vm4679_vm12, %v561_v35, %v3465_v44  ;;  %v3389_v3 = vld [vmem:[%s3871_s24 + $0x74] sm:$0x1] }
 0x48d   : > { %v3467_v5 = vld [vmem:[%s3871_s24 + $0x54] sm:$0xf]  ;;  %v4845_v63 = vrot.slane %v580_v8, 7  ;;  %v472_v56 = vshll.u32 %v4631_v33, 16  ;;  %v518_v22 = vrot.slane %v4703_v15, 4  ;;  %v523_v60 = vshll.u32 %v4690_v16, 16  ;;  %3078 = vrot.lane.b32.xlu0 %v4512_v2, %s3795_s26  ;;  %3082 = vrot.lane.b32.xlu1 %v2965_v34, %s3795_s26 }
 0x48e   : > { %3466 = vst [vmem:[%s3871_s24 + $0x50] sm:$0x1] %v825_v50  ;;  %v828_v46 = vsel %vm4575_vm10, %v568_v26, %v3467_v5  ;;  %v3470_v48 = vld [vmem:[%s3871_s24 + $0x5c] sm:$0x1]  ;;  %v590_v25 = vrot.slane %v588_v1, 7  ;;  %v492_v12 = vsel %vm4350_vm7, %v484_v36, %v491_v62  ;;  %v501_v27 = vrot.slane %v4701_v45, 4 }
 0x48f   : > { %3468 = vst [vmem:[%s3871_s24 + $0x54] sm:$0xf] %v828_v46  ;;  %v832_v35 = vsel %vm4679_vm12, %v578_v14, %v3470_v48  ;;  %v585_v33 = vor.u32 %v583_v6, %v4845_v63  ;;  %v3472_v43 = vld [vmem:[%s3871_s24 + $0x60] sm:$0xf]  ;;  %3444 = vst.msk [vmem:[%s3871_s24 + $0x1c] sm:$0xf] %vm780_vm9, %v492_v12  ;;  %v474_v15 = vor.u32 %v472_v56, %v4666_v32 }
 0x490   : > { %3471 = vst [vmem:[%s3871_s24 + $0x5c] sm:$0x1] %v832_v35  ;;  %v595_v36 = vrot.slane %v590_v25, 4  ;;  %v525_v16 = vor.u32 %v523_v60, %v4726_v31  ;;  %v506_v39 = vshll.u32 %v4671_v28, 16  ;;  %v552_v54 = vrot.slane %v4755_v13, 4  ;;  %v347_v44 = vld [vmem:[%s4184_s14 + $0x88] sm:$0xff] }
 0x491   : > { %v835_v32 = vsel %vm4575_vm10, %v585_v33, %v3472_v43  ;;  %v3475_v45 = vld [vmem:[%s3871_s24 + $0x68] sm:$0x1]  ;;  %v475_v31 = vsel %vm4350_vm7, %v467_v17, %v474_v15  ;;  %v557_v28 = vshll.u32 %v4748_v49, 16  ;;  %v535_v13 = vrot.slane %v4753_v19, 4  ;;  %v3357_v26 = vld [vmem:[%s3871_s24 + $0x6c] sm:$0x1]  ;;  %3084 = vrot.lane.b32.xlu0 %v4524_v11, %s3795_s26 }
 0x492   : > { %3473 = vst [vmem:[%s3871_s24 + $0x60] sm:$0xf] %v835_v32  ;;  %v839_v2 = vsel %vm4679_vm12, %v595_v36, %v3475_v45  ;;  %3439 = vst.msk [vmem:[%s3871_s24 + $0x10] sm:$0xf] %vm780_vm9, %v475_v31  ;;  %v526_v51 = vsel %vm4350_vm7, %v518_v22, %v525_v16  ;;  %v508_v34 = vor.u32 %v506_v39, %v4709_v40  ;;  %v540_v17 = vshll.u32 %v4729_v57, 16  ;;  %v348_v1 = vld [vmem:[%s4184_s14 + $0x90] sm:$0xff] }
 0x493   : > { %3476 = vst [vmem:[%s3871_s24 + $0x68] sm:$0x1] %v839_v2  ;;  %3454 = vst.msk [vmem:[%s3871_s24 + $0x34] sm:$0xf] %vm780_vm9, %v526_v51  ;;  %v559_v49 = vor.u32 %v557_v28, %v4785_v0  ;;  %v569_v19 = vrot.slane %v4814_v23, 4  ;;  %v574_v8 = vshll.u32 %v4790_v20, 16  ;;  %v4929_v56 = vpack.c.bf16 %v347_v44, %v347_v44 }
 0x494   : > { %v586_v6 = vrot.slane %v4845_v63, 4  ;;  %v509_v40 = vsel %vm4350_vm7, %v501_v27, %v508_v34  ;;  %v542_v57 = vor.u32 %v540_v17, %v4783_v37  ;;  %v591_v14 = vshll.u32 %v4818_v55, 16  ;;  %v3359_v23 = vld [vmem:[%s3871_s24 + $0x78] sm:$0x1]  ;;  %v3391_v11 = vld [vmem:[%s3871_s24 + $0x80] sm:$0x1] }
 0x495   : > { %v257_v0 = vsel %vm4171_vm5, 0, %v3357_v26  ;;  %v5401_v20 = vrot.slane %v4517_v47, 4  ;;  %3449 = vst.msk [vmem:[%s3871_s24 + $0x28] sm:$0xf] %vm780_vm9, %v509_v40  ;;  %v560_v37 = vsel %vm4350_vm7, %v552_v54, %v559_v49  ;;  %v576_v55 = vor.u32 %v574_v8, %v4820_v21  ;;  %v349_v5 = vld [vmem:[%s4184_s14 + $0x98] sm:$0xff]  ;;  %v350_v12 = vld [vmem:[%s4184_s14 + $0xa0] sm:$0xff]  ;;  %3090 = vrot.lane.b32.xlu0 %v4531_v18, %s3795_s26 }
 0x496   : > { %3358 = vst [vmem:[%s3871_s24 + $0x6c] sm:$0x1] %v257_v0  ;;  %v597_v62 = vshrl.u32 %v4828_v42, 16  ;;  %v600_v50 = vshll.u32 %v4828_v42, 16  ;;  %3464 = vst.msk [vmem:[%s3871_s24 + $0x4c] sm:$0xf] %vm780_vm9, %v560_v37  ;;  %v543_v47 = vsel %vm4350_vm7, %v535_v13, %v542_v57  ;;  %v593_v63 = vor.u32 %v591_v14, %v590_v25 }
 0x497   : > { %3088 = vrot.lane.b32.xlu1 %v5401_v20, %s3795_s26  ;;  %v307_v21 = vsel %vm4587_vm11, 0, %v3389_v3  ;;  %v3361_v22 = vld [vmem:[%s3871_s24 + $0x84] sm:$0x1]  ;;  %3459 = vst.msk [vmem:[%s3871_s24 + $0x40] sm:$0xf] %vm780_vm9, %v543_v47  ;;  %v577_v42 = vsel %vm4350_vm7, %v569_v19, %v576_v55  ;;  %v260_v48 = vsel %vm4171_vm5, 0, %v3359_v23  ;;  %v3675_v25 = vpack.c.bf16 %v348_v1, %v348_v1 }
 0x498   : > { %v4936_v46 = vrot.slane %v597_v62, 7  ;;  %3390 = vst [vmem:[%s3871_s24 + $0x74] sm:$0x1] %v307_v21  ;;  %v3393_v60 = vld [vmem:[%s3871_s24 + $0x8c] sm:$0x1]  ;;  %v594_v35 = vsel %vm4350_vm7, %v586_v6, %v593_v63  ;;  %v605_v33 = vshrl.u32 %v4929_v56, 16  ;;  %v4951_v15 = vpack.c.bf16 %v349_v5, %v349_v5 }
 0x499   : > { %3469 = vst.msk [vmem:[%s3871_s24 + $0x58] sm:$0xf] %vm780_vm9, %v577_v42  ;;  %3360 = vst [vmem:[%s3871_s24 + $0x78] sm:$0x1] %v260_v48  ;;  %v310_v43 = vsel %vm4587_vm11, 0, %v3391_v11  ;;  %v351_v27 = vld [vmem:[%s4184_s14 + $0xa8] sm:$0xff]  ;;  %3050 = vrot.lane.b32.xlu0 %v4559_v4, %s3795_s26 }
 0x49a   : > { %v3363_v36 = vld [vmem:[%s3871_s24 + $0x90] sm:$0x1]  ;;  %v5402_v39 = vrot.slane %v4533_v53, 4  ;;  %3474 = vst.msk [vmem:[%s3871_s24 + $0x64] sm:$0xf] %vm780_vm9, %v594_v35  ;;  %v602_v54 = vor.u32 %v600_v50, %v4936_v46  ;;  %v614_v32 = vshrl.u32 %v3675_v25, 16  ;;  %v3677_v53 = vpack.c.bf16 %v350_v12, %v350_v12 }
 0x49b   : > { %v352_v16 = vld [vmem:[%s4184_s14 + $0xb0] sm:$0xff]  ;;  %v617_v45 = vshll.u32 %v3675_v25, 16  ;;  %3392 = vst [vmem:[%s3871_s24 + $0x80] sm:$0x1] %v310_v43  ;;  %v263_v31 = vsel %vm4171_vm5, 0, %v3361_v22  ;;  %v4967_v28 = vrot.slane %v605_v33, 7  ;;  %v4976_v2 = vpack.c.bf16 %v351_v27, %v351_v27 }
 0x49c   : > { %3094 = vrot.lane.b32.xlu1 %v5402_v39, %s3795_s26  ;;  %v622_v18 = vshrl.u32 %v4951_v15, 16  ;;  %3362 = vst [vmem:[%s3871_s24 + $0x84] sm:$0x1] %v263_v31  ;;  %v313_v13 = vsel %vm4587_vm11, 0, %v3393_v60  ;;  %v4973_v26 = vrot.slane %v614_v32, 7  ;;  %v266_v51 = vsel %vm4171_vm5, 0, %v3363_v36 }
 0x49d   : > { %3394 = vst [vmem:[%s3871_s24 + $0x8c] sm:$0x1] %v313_v13  ;;  %v3679_v34 = vpack.c.bf16 %v352_v16, %v352_v16  ;;  %v3395_v17 = vld [vmem:[%s3871_s24 + $0x98] sm:$0x1]  ;;  %v3477_v19 = vld [vmem:[%s3871_s24 + $0x6c] sm:$0xf]  ;;  %3062 = vrot.lane.b32.xlu0 %v4594_v9, %s3795_s26 }
 0x49e   : > { %v353_v49 = vld [vmem:[%s4184_s14 + $0xb8] sm:$0xff]  ;;  %v612_v8 = vrot.slane %v4967_v28, 4  ;;  %v4984_v6 = vrot.slane %v622_v18, 7  ;;  %v631_v3 = vshrl.u32 %v3677_v53, 16  ;;  %v634_v44 = vshll.u32 %v3677_v53, 16  ;;  %v354_v1 = vld [vmem:[%s4184_s14 + $0xc0] sm:$0xff] }
 0x49f   : > { %3364 = vst [vmem:[%s3871_s24 + $0x90] sm:$0x1] %v266_v51  ;;  %v842_v40 = vsel %vm4575_vm10, %v602_v54, %v3477_v19  ;;  %v619_v57 = vor.u32 %v617_v45, %v4973_v26  ;;  %v639_v14 = vshrl.u32 %v4976_v2, 16  ;;  %v648_v0 = vshrl.u32 %v3679_v34, 16  ;;  %v3365_v23 = vld [vmem:[%s3871_s24 + $0x9c] sm:$0x1] }
 0x4a0   : > { %3056 = vrot.lane.b32.xlu1 %v4552_v38, %s3795_s26  ;;  %3478 = vst [vmem:[%s3871_s24 + $0x6c] sm:$0xf] %v842_v40  ;;  %v3480_v38 = vld [vmem:[%s3871_s24 + $0x74] sm:$0x1]  ;;  %v629_v20 = vrot.slane %v4984_v6, 4  ;;  %v5000_v4 = vrot.slane %v631_v3, 7  ;;  %v5013_v63 = vpack.c.bf16 %v353_v49, %v353_v49  ;;  %v3681_v60 = vpack.c.bf16 %v354_v1, %v354_v1 }
 0x4a1   : > { %v651_v37 = vshll.u32 %v3679_v34, 16  ;;  %v316_v55 = vsel %vm4587_vm11, 0, %v3395_v17  ;;  %v355_v62 = vld [vmem:[%s4184_s14 + $0xc8] sm:$0xff]  ;;  %v846_v50 = vsel %vm4679_vm12, %v612_v8, %v3480_v38  ;;  %v3482_v11 = vld [vmem:[%s3871_s24 + $0x78] sm:$0xf]  ;;  %v5008_v5 = vrot.slane %v639_v14, 7  ;;  %v3001_v8 = vpop.permute.xlu0 %3000  ;;  %3074 = vrot.lane.b32.xlu0 %v4627_v61, %s3795_s26 }
 0x4a2   : > { %v5010_v47 = vrot.slane %v648_v0, 7  ;;  %3396 = vst [vmem:[%s3871_s24 + $0x98] sm:$0x1] %v316_v55  ;;  %v3397_v21 = vld [vmem:[%s3871_s24 + $0xa4] sm:$0x1]  ;;  %v849_v42 = vsel %vm4575_vm10, %v619_v57, %v3482_v11  ;;  %v636_v25 = vor.u32 %v634_v44, %v5000_v4  ;;  %v269_v12 = vsel %vm4171_vm5, 0, %v3365_v23 }
 0x4a3   : > { %v3573_v22 = vld [vmem:[%s3871_s24 + $0xc] sm:$0xf]  ;;  %3481 = vst [vmem:[%s3871_s24 + $0x74] sm:$0x1] %v846_v50  ;;  %v3485_v48 = vld [vmem:[%s3871_s24 + $0x80] sm:$0x1]  ;;  %v5059_v17 = vpack.c.bf16 %v355_v62, %v355_v62 }
 0x4a4   : > { %v3367_v35 = vld [vmem:[%s3871_s24 + $0xa8] sm:$0x1]  ;;  %v356_v33 = vld [vmem:[%s4184_s14 + $0xd0] sm:$0xff]  ;;  %3068 = vrot.lane.b32.xlu1 %v4571_v52, %s3795_s26  ;;  %3483 = vst [vmem:[%s3871_s24 + $0x78] sm:$0xf] %v849_v42  ;;  %v853_v43 = vsel %vm4679_vm12, %v629_v20, %v3485_v48  ;;  %v646_v36 = vrot.slane %v5008_v5, 4  ;;  %v653_v16 = vor.u32 %v651_v37, %v5010_v47  ;;  %v3147_v1 = vsel %vm5041_vm14, %v3001_v8, %v3573_v22 }
 0x4a5   : > { %v3487_v27 = vld [vmem:[%s3871_s24 + $0x84] sm:$0xf]  ;;  %v656_v39 = vshrl.u32 %v5013_v63, 16  ;;  %3366 = vst [vmem:[%s3871_s24 + $0x9c] sm:$0x1] %v269_v12  ;;  %v665_v45 = vshrl.u32 %v3681_v60, 16  ;;  %v3683_v57 = vpack.c.bf16 %v356_v33, %v356_v33  ;;  %3086 = vrot.lane.b32.xlu0 %v4650_v59, %s3795_s26 }
 0x4a6   : > { %v3399_v52 = vld [vmem:[%s3871_s24 + $0xb0] sm:$0x1]  ;;  %3486 = vst [vmem:[%s3871_s24 + $0x80] sm:$0x1] %v853_v43  ;;  %v856_v54 = vsel %vm4575_vm10, %v636_v25, %v3487_v27  ;;  %v3490_v32 = vld [vmem:[%s3871_s24 + $0x8c] sm:$0x1] }
 0x4a7   : > { %v668_v31 = vshll.u32 %v3681_v60, 16  ;;  %v319_v18 = vsel %vm4587_vm11, 0, %v3397_v21  ;;  %v357_v53 = vld [vmem:[%s4184_s14 + $0xd8] sm:$0xff]  ;;  %3488 = vst [vmem:[%s3871_s24 + $0x84] sm:$0xf] %v856_v54  ;;  %v860_v13 = vsel %vm4679_vm12, %v646_v36, %v3490_v32  ;;  %v5056_v34 = vrot.slane %v656_v39, 7 }
 0x4a8   : > { %v3492_v51 = vld [vmem:[%s3871_s24 + $0x90] sm:$0xf]  ;;  %3398 = vst [vmem:[%s3871_s24 + $0xa4] sm:$0x1] %v319_v18  ;;  %v272_v49 = vsel %vm4171_vm5, 0, %v3367_v35  ;;  %v5068_v40 = vrot.slane %v665_v45, 7  ;;  %3080 = vrot.lane.b32.xlu1 %v4616_v10, %s3795_s26  ;;  %v5085_v37 = vpack.c.bf16 %v357_v53, %v357_v53  ;;  %v3007_v10 = vpop.permute.xlu1 %3006 }
 0x4a9   : > { %v3369_v19 = vld [vmem:[%s3871_s24 + $0xb4] sm:$0x1]  ;;  %v3578_v3 = vld [vmem:[%s3871_s24 + $0x18] sm:$0xf]  ;;  %3491 = vst [vmem:[%s3871_s24 + $0x8c] sm:$0x1] %v860_v13  ;;  %v863_v44 = vsel %vm4575_vm10, %v653_v16, %v3492_v51 }
 0x4aa   : > { %3368 = vst [vmem:[%s3871_s24 + $0xa8] sm:$0x1] %v272_v49  ;;  %v322_v14 = vsel %vm4587_vm11, 0, %v3399_v52  ;;  %v358_v0 = vld [vmem:[%s4184_s14 + $0xe0] sm:$0xff]  ;;  %v359_v23 = vld [vmem:[%s4184_s14 + $0xe8] sm:$0xff]  ;;  %v663_v38 = vrot.slane %v5056_v34, 4  ;;  %v670_v61 = vor.u32 %v668_v31, %v5068_v40  ;;  %v3157_v42 = vsel %vm5041_vm14, %v3007_v10, %v3578_v3 }
 0x4ab   : > { %3493 = vst [vmem:[%s3871_s24 + $0x90] sm:$0xf] %v863_v44  ;;  %v673_v20 = vshrl.u32 %v5059_v17, 16  ;;  %3400 = vst [vmem:[%s3871_s24 + $0xb0] sm:$0x1] %v322_v14  ;;  %v682_v11 = vshrl.u32 %v3683_v57, 16  ;;  %v3685_v43 = vpack.c.bf16 %v358_v0, %v358_v0  ;;  %v5110_v36 = vpack.c.bf16 %v359_v23, %v359_v23 }
 0x4ac   : > { %v3401_v55 = vld [vmem:[%s3871_s24 + $0xbc] sm:$0x1]  ;;  %v3371_v62 = vld [vmem:[%s3871_s24 + $0xc0] sm:$0x1]  ;;  %3574 = vst [vmem:[%s3871_s24 + $0xc] sm:$0xf] %v3147_v1  ;;  %3092 = vrot.lane.b32.xlu1 %v4639_v7, %s3795_s26 }
 0x4ad   : > { %v3495_v50 = vld [vmem:[%s3871_s24 + $0x98] sm:$0x1]  ;;  %v685_v21 = vshll.u32 %v3683_v57, 16  ;;  %v275_v22 = vsel %vm4171_vm5, 0, %v3369_v19  ;;  %v5098_v25 = vrot.slane %v673_v20, 7  ;;  %v690_v12 = vshrl.u32 %v5085_v37, 16 }
 0x4ae   : > { %v867_v48 = vsel %vm4679_vm12, %v663_v38, %v3495_v50  ;;  %3370 = vst [vmem:[%s3871_s24 + $0xb4] sm:$0x1] %v275_v22  ;;  %v360_v60 = vld [vmem:[%s4184_s14 + $0xf0] sm:$0xff]  ;;  %3579 = vst [vmem:[%s3871_s24 + $0x18] sm:$0xf] %v3157_v42  ;;  %v5106_v33 = vrot.slane %v682_v11, 7 }
 0x4af   : > { %3496 = vst [vmem:[%s3871_s24 + $0x98] sm:$0x1] %v867_v48  ;;  %v3497_v35 = vld [vmem:[%s3871_s24 + $0x9c] sm:$0xf]  ;;  %v325_v27 = vsel %vm4587_vm11, 0, %v3401_v55  ;;  %v680_v52 = vrot.slane %v5098_v25, 4  ;;  %v3687_v18 = vpack.c.bf16 %v360_v60, %v360_v60 }
 0x4b0   : > { %v361_v16 = vld [vmem:[%s4184_s14 + $0xf8] sm:$0xff]  ;;  %v870_v39 = vsel %vm4575_vm10, %v670_v61, %v3497_v35  ;;  %v5120_v54 = vrot.slane %v690_v12, 7  ;;  %3402 = vst [vmem:[%s3871_s24 + $0xbc] sm:$0x1] %v325_v27  ;;  %v278_v32 = vsel %vm4171_vm5, 0, %v3371_v62  ;;  %v687_v7 = vor.u32 %v685_v21, %v5106_v33 }
 0x4b1   : > { %3498 = vst [vmem:[%s3871_s24 + $0x9c] sm:$0xf] %v870_v39  ;;  %v3500_v45 = vld [vmem:[%s3871_s24 + $0xa4] sm:$0x1]  ;;  %v699_v31 = vshrl.u32 %v3685_v43, 16  ;;  %v702_v59 = vshll.u32 %v3685_v43, 16  ;;  %v5135_v19 = vpack.c.bf16 %v361_v16, %v361_v16 }
 0x4b2   : > { %3372 = vst [vmem:[%s3871_s24 + $0xc0] sm:$0x1] %v278_v32  ;;  %v3403_v53 = vld [vmem:[%s3871_s24 + $0xc8] sm:$0x1]  ;;  %v874_v13 = vsel %vm4679_vm12, %v680_v52, %v3500_v45  ;;  %v697_v24 = vrot.slane %v5120_v54, 4  ;;  %v707_v49 = vshrl.u32 %v5110_v36, 16 }
 0x4b3   : > { %v3502_v51 = vld [vmem:[%s3871_s24 + $0xa8] sm:$0xf]  ;;  %3501 = vst [vmem:[%s3871_s24 + $0xa4] sm:$0x1] %v874_v13  ;;  %v3505_v3 = vld [vmem:[%s3871_s24 + $0xb0] sm:$0x1] }
 0x4b4   : > { %v877_v8 = vsel %vm4575_vm10, %v687_v7, %v3502_v51  ;;  %v5141_v44 = vrot.slane %v699_v31, 7  ;;  %v716_v57 = vshrl.u32 %v3687_v18, 16  ;;  %v881_v14 = vsel %vm4679_vm12, %v697_v24, %v3505_v3  ;;  %v3581_v13 = vld [vmem:[%s3871_s24 + $0x20] sm:$0x1] }
 0x4b5   : > { %3503 = vst [vmem:[%s3871_s24 + $0xa8] sm:$0xf] %v877_v8  ;;  %v709_v0 = vrot.slane %v707_v49, 7  ;;  %v719_v23 = vshll.u32 %v3687_v18, 16  ;;  %v328_v1 = vsel %vm4587_vm11, 0, %v3403_v53  ;;  %v724_v62 = vshrl.u32 %v5135_v19, 16 }
 0x4b6   : > { %3506 = vst [vmem:[%s3871_s24 + $0xb0] sm:$0x1] %v881_v14  ;;  %v704_v38 = vor.u32 %v702_v59, %v5141_v44  ;;  %v3507_v20 = vld [vmem:[%s3871_s24 + $0xb4] sm:$0xf]  ;;  %v718_v55 = vrot.slane %v716_v57, 7  ;;  %v603_v10 = vrot.slane %v4936_v46, 4 }
 0x4b7   : > { %3404 = vst [vmem:[%s3871_s24 + $0xc8] sm:$0x1] %v328_v1  ;;  %v714_v50 = vrot.slane %v709_v0, 4  ;;  %v608_v61 = vshll.u32 %v4929_v56, 16  ;;  %v620_v11 = vrot.slane %v4973_v26, 4  ;;  %v625_v29 = vshll.u32 %v4951_v15, 16 }
 0x4b8   : > { %v884_v21 = vsel %vm4575_vm10, %v704_v38, %v3507_v20  ;;  %v3510_v22 = vld [vmem:[%s3871_s24 + $0xbc] sm:$0x1]  ;;  %v721_v42 = vor.u32 %v719_v23, %v718_v55  ;;  %v726_v48 = vrot.slane %v724_v62, 7  ;;  %v637_v12 = vrot.slane %v5000_v4, 4  ;;  %v3576_v53 = vld [vmem:[%s3871_s24 + $0x14] sm:$0x1] }
 0x4b9   : > { %3508 = vst [vmem:[%s3871_s24 + $0xb4] sm:$0xf] %v884_v21  ;;  %v888_v46 = vsel %vm4679_vm12, %v714_v50, %v3510_v22  ;;  %v3512_v56 = vld [vmem:[%s3871_s24 + $0xc0] sm:$0xf]  ;;  %v610_v26 = vor.u32 %v608_v61, %v4967_v28  ;;  %v627_v15 = vor.u32 %v625_v29, %v4984_v6  ;;  %v642_v60 = vshll.u32 %v4976_v2, 16 }
 0x4ba   : > { %3511 = vst [vmem:[%s3871_s24 + $0xbc] sm:$0x1] %v888_v46  ;;  %v891_v35 = vsel %vm4575_vm10, %v721_v42, %v3512_v56  ;;  %v731_v43 = vrot.slane %v726_v48, 4  ;;  %v654_v4 = vrot.slane %v5010_v47, 4  ;;  %v659_v27 = vshll.u32 %v5013_v63, 16 }
 0x4bb   : > { %3513 = vst [vmem:[%s3871_s24 + $0xc0] sm:$0xf] %v891_v35  ;;  %v611_v16 = vsel %vm4350_vm7, %v603_v10, %v610_v26  ;;  %v628_v28 = vsel %vm4350_vm7, %v620_v11, %v627_v15  ;;  %v644_v2 = vor.u32 %v642_v60, %v5008_v5  ;;  %v671_v6 = vrot.slane %v5068_v40, 4  ;;  %v3588_v8 = vld [vmem:[%s3871_s24 + $0x30] sm:$0xf] }
 0x4bc   : > { %3479 = vst.msk [vmem:[%s3871_s24 + $0x70] sm:$0xf] %vm780_vm9, %v611_v16  ;;  %3484 = vst.msk [vmem:[%s3871_s24 + $0x7c] sm:$0xf] %vm780_vm9, %v628_v28  ;;  %v661_v30 = vor.u32 %v659_v27, %v5056_v34  ;;  %v676_v47 = vshll.u32 %v5059_v17, 16  ;;  %v688_v63 = vrot.slane %v5106_v33, 4 }
 0x4bd   : > { %v693_v39 = vshll.u32 %v5085_v37, 16  ;;  %v645_v5 = vsel %vm4350_vm7, %v637_v12, %v644_v2  ;;  %v705_v40 = vrot.slane %v5141_v44, 4  ;;  %v710_v32 = vshll.u32 %v5110_v36, 16  ;;  %v3591_v23 = vld [vmem:[%s3871_s24 + $0x38] sm:$0x1] }
 0x4be   : > { %v3515_v52 = vld [vmem:[%s3871_s24 + $0xc8] sm:$0x1]  ;;  %3489 = vst.msk [vmem:[%s3871_s24 + $0x88] sm:$0xf] %vm780_vm9, %v645_v5  ;;  %v662_v34 = vsel %vm4350_vm7, %v654_v4, %v661_v30  ;;  %v678_v17 = vor.u32 %v676_v47, %v5098_v25  ;;  %v722_v36 = vrot.slane %v718_v55, 4  ;;  %v727_v41 = vshll.u32 %v5135_v19, 16 }
 0x4bf   : > { %v895_v45 = vsel %vm4679_vm12, %v731_v43, %v3515_v52  ;;  %v695_v37 = vor.u32 %v693_v39, %v5120_v54  ;;  %3494 = vst.msk [vmem:[%s3871_s24 + $0x94] sm:$0xf] %vm780_vm9, %v662_v34  ;;  %v712_v33 = vor.u32 %v710_v32, %v709_v0  ;;  %v3005_v51 = vpop.permute.xlu0 %3004  ;;  %v3011_v24 = vpop.permute.xlu1 %3010  ;;  %v3583_v19 = vld [vmem:[%s3871_s24 + $0x24] sm:$0xf]  ;;  %v3586_v0 = vld [vmem:[%s3871_s24 + $0x2c] sm:$0x1] }
 0x4c0   : > { %3516 = vst [vmem:[%s3871_s24 + $0xc8] sm:$0x1] %v895_v45  ;;  %v679_v7 = vsel %vm4350_vm7, %v671_v6, %v678_v17  ;;  %v729_v54 = vor.u32 %v727_v41, %v726_v48  ;;  %v3154_v58 = vsel %vm5222_vm0, %v3005_v51, %v3576_v53  ;;  %v3161_v49 = vsel %vm5222_vm0, %v3011_v24, %v3581_v13  ;;  %v3593_v62 = vld [vmem:[%s3871_s24 + $0x3c] sm:$0xf]  ;;  %v3598_v10 = vld [vmem:[%s3871_s24 + $0x48] sm:$0xf] }
 0x4c1   : > { %v696_v31 = vsel %vm4350_vm7, %v688_v63, %v695_v37  ;;  %3499 = vst.msk [vmem:[%s3871_s24 + $0xa0] sm:$0xf] %vm780_vm9, %v679_v7  ;;  %v713_v25 = vsel %vm4350_vm7, %v705_v40, %v712_v33  ;;  %3577 = vst [vmem:[%s3871_s24 + $0x14] sm:$0x1] %v3154_v58  ;;  %v3596_v21 = vld [vmem:[%s3871_s24 + $0x44] sm:$0x1] }
 0x4c2   : > { %3504 = vst.msk [vmem:[%s3871_s24 + $0xac] sm:$0xf] %vm780_vm9, %v696_v31  ;;  %3509 = vst.msk [vmem:[%s3871_s24 + $0xb8] sm:$0xf] %vm780_vm9, %v713_v25  ;;  %v730_v59 = vsel %vm4350_vm7, %v722_v36, %v729_v54  ;;  %v3601_v22 = vld [vmem:[%s3871_s24 + $0x50] sm:$0x1] }
 0x4c3   : > { %3514 = vst.msk [vmem:[%s3871_s24 + $0xc4] sm:$0xf] %vm780_vm9, %v730_v59  ;;  %3582 = vst [vmem:[%s3871_s24 + $0x20] sm:$0x1] %v3161_v49  ;;  %v3013_v3 = vpop.permute.xlu0 %3012  ;;  %v3019_v44 = vpop.permute.xlu1 %3018  ;;  %v3603_v56 = vld [vmem:[%s3871_s24 + $0x54] sm:$0xf] }
 0x4c4   : > { %v3164_v57 = vsel %vm5041_vm14, %v3013_v3, %v3583_v19  ;;  %v3171_v14 = vsel %vm5041_vm14, %v3019_v44, %v3588_v8  ;;  %v3606_v26 = vld [vmem:[%s3871_s24 + $0x5c] sm:$0x1]  ;;  %v3608_v4 = vld [vmem:[%s3871_s24 + $0x60] sm:$0xf]  ;;  %v3611_v27 = vld [vmem:[%s3871_s24 + $0x68] sm:$0x1] }
 0x4c5   : > { %3584 = vst [vmem:[%s3871_s24 + $0x24] sm:$0xf] %v3164_v57  ;;  %3589 = vst [vmem:[%s3871_s24 + $0x30] sm:$0xf] %v3171_v14  ;;  %v3613_v45 = vld [vmem:[%s3871_s24 + $0x6c] sm:$0xf] }
 0x4c6   : > { %v3616_v34 = vld [vmem:[%s3871_s24 + $0x74] sm:$0x1]  ;;  %v3618_v41 = vld [vmem:[%s3871_s24 + $0x78] sm:$0xf]  ;;  %v3621_v7 = vld [vmem:[%s3871_s24 + $0x80] sm:$0x1] }
 0x4c7   : > { %v3017_v1 = vpop.permute.xlu0 %3016  ;;  %v3023_v38 = vpop.permute.xlu1 %3022  ;;  %v3623_v53 = vld [vmem:[%s3871_s24 + $0x84] sm:$0xf]  ;;  %v3626_v13 = vld [vmem:[%s3871_s24 + $0x8c] sm:$0x1]  ;;  %v3628_v19 = vld [vmem:[%s3871_s24 + $0x90] sm:$0xf] }
 0x4c8   : > { %v3168_v20 = vsel %vm5222_vm0, %v3017_v1, %v3586_v0  ;;  %v3175_v55 = vsel %vm5222_vm0, %v3023_v38, %v3591_v23  ;;  %v3631_v8 = vld [vmem:[%s3871_s24 + $0x98] sm:$0x1]  ;;  %v3633_v0 = vld [vmem:[%s3871_s24 + $0x9c] sm:$0xf]  ;;  %v3636_v23 = vld [vmem:[%s3871_s24 + $0xa4] sm:$0x1] }
 0x4c9   : > { %3587 = vst [vmem:[%s3871_s24 + $0x2c] sm:$0x1] %v3168_v20  ;;  %3592 = vst [vmem:[%s3871_s24 + $0x38] sm:$0x1] %v3175_v55 }
 0x4cb   : > { %v3025_v50 = vpop.permute.xlu0 %3024  ;;  %v3031_v61 = vpop.permute.xlu1 %3030 }
 0x4cc   : > { %v3178_v11 = vsel %vm5041_vm14, %v3025_v50, %v3593_v62  ;;  %v3185_v29 = vsel %vm5041_vm14, %v3031_v61, %v3598_v10  ;;  %v3638_v62 = vld [vmem:[%s3871_s24 + $0xa8] sm:$0xf]  ;;  %v3641_v10 = vld [vmem:[%s3871_s24 + $0xb0] sm:$0x1] }
 0x4cd   : > { %3594 = vst [vmem:[%s3871_s24 + $0x3c] sm:$0xf] %v3178_v11  ;;  %3599 = vst [vmem:[%s3871_s24 + $0x48] sm:$0xf] %v3185_v29 }
 0x4cf   : > { %v3029_v42 = vpop.permute.xlu0 %3028  ;;  %v3035_v48 = vpop.permute.xlu1 %3034 }
 0x4d0   : > { %v3182_v12 = vsel %vm5222_vm0, %v3029_v42, %v3596_v21  ;;  %v3189_v46 = vsel %vm5222_vm0, %v3035_v48, %v3601_v22  ;;  %v3643_v21 = vld [vmem:[%s3871_s24 + $0xb4] sm:$0xf]  ;;  %v3646_v22 = vld [vmem:[%s3871_s24 + $0xbc] sm:$0x1] }
 0x4d1   : > { %3597 = vst [vmem:[%s3871_s24 + $0x44] sm:$0x1] %v3182_v12  ;;  %3602 = vst [vmem:[%s3871_s24 + $0x50] sm:$0x1] %v3189_v46 }
 0x4d3   : > { %v3037_v15 = vpop.permute.xlu0 %3036  ;;  %v3041_v60 = vpop.permute.xlu1 %3040 }
 0x4d4   : > { %v3192_v35 = vsel %vm5041_vm14, %v3037_v15, %v3603_v56  ;;  %v3196_v43 = vsel %vm5222_vm0, %v3041_v60, %v3606_v26  ;;  %v3648_v56 = vld [vmem:[%s3871_s24 + $0xc0] sm:$0xf]  ;;  %v3651_v26 = vld [vmem:[%s3871_s24 + $0xc8] sm:$0x1] }
 0x4d5   : > { %3604 = vst [vmem:[%s3871_s24 + $0x54] sm:$0xf] %v3192_v35  ;;  %3607 = vst [vmem:[%s3871_s24 + $0x5c] sm:$0x1] %v3196_v43 }
 0x4d7   : > { %v3043_v16 = vpop.permute.xlu0 %3042  ;;  %v3047_v28 = vpop.permute.xlu1 %3046 }
 0x4d8   : > { %v3199_v2 = vsel %vm5041_vm14, %v3043_v16, %v3608_v4  ;;  %v3203_v6 = vsel %vm5222_vm0, %v3047_v28, %v3611_v27 }
 0x4d9   : > { %3609 = vst [vmem:[%s3871_s24 + $0x60] sm:$0xf] %v3199_v2  ;;  %3612 = vst [vmem:[%s3871_s24 + $0x68] sm:$0x1] %v3203_v6 }
 0x4db   : > { %v3009_v30 = vpop.permute.xlu0 %3008  ;;  %v3003_v47 = vpop.permute.xlu1 %3002 }
 0x4dc   : > { %3580 = vst.msk [vmem:[%s3871_s24 + $0x1c] sm:$0xf] %vm3144_vm13, %v3009_v30  ;;  %3575 = vst.msk [vmem:[%s3871_s24 + $0x10] sm:$0xf] %vm3144_vm13, %v3003_v47 }
 0x4df   : > { %v3021_v63 = vpop.permute.xlu0 %3020  ;;  %v3015_v39 = vpop.permute.xlu1 %3014 }
 0x4e0   : > { %3590 = vst.msk [vmem:[%s3871_s24 + $0x34] sm:$0xf] %vm3144_vm13, %v3021_v63  ;;  %3585 = vst.msk [vmem:[%s3871_s24 + $0x28] sm:$0xf] %vm3144_vm13, %v3015_v39 }
 0x4e3   : > { %v3033_v52 = vpop.permute.xlu0 %3032  ;;  %v3027_v5 = vpop.permute.xlu1 %3026 }
 0x4e4   : > { %3600 = vst.msk [vmem:[%s3871_s24 + $0x4c] sm:$0xf] %vm3144_vm13, %v3033_v52  ;;  %3595 = vst.msk [vmem:[%s3871_s24 + $0x40] sm:$0xf] %vm3144_vm13, %v3027_v5 }
 0x4e7   : > { %v3039_v40 = vpop.permute.xlu0 %3038  ;;  %v3045_v32 = vpop.permute.xlu1 %3044 }
 0x4e8   : > { %3605 = vst.msk [vmem:[%s3871_s24 + $0x58] sm:$0xf] %vm3144_vm13, %v3039_v40  ;;  %3610 = vst.msk [vmem:[%s3871_s24 + $0x64] sm:$0xf] %vm3144_vm13, %v3045_v32 }
 0x4eb   : > { %v3049_v17 = vpop.permute.xlu0 %3048  ;;  %v3053_v37 = vpop.permute.xlu1 %3052 }
 0x4ec   : > { %v3206_v33 = vsel %vm5041_vm14, %v3049_v17, %v3613_v45  ;;  %v3210_v36 = vsel %vm5222_vm0, %v3053_v37, %v3616_v34 }
 0x4ed   : > { %3614 = vst [vmem:[%s3871_s24 + $0x6c] sm:$0xf] %v3206_v33  ;;  %3617 = vst [vmem:[%s3871_s24 + $0x74] sm:$0x1] %v3210_v36 }
 0x4ef   : > { %v3055_v31 = vpop.permute.xlu0 %3054  ;;  %v3059_v25 = vpop.permute.xlu1 %3058 }
 0x4f0   : > { %v3213_v54 = vsel %vm5041_vm14, %v3055_v31, %v3618_v41  ;;  %v3217_v59 = vsel %vm5222_vm0, %v3059_v25, %v3621_v7 }
 0x4f1   : > { %3619 = vst [vmem:[%s3871_s24 + $0x78] sm:$0xf] %v3213_v54  ;;  %3622 = vst [vmem:[%s3871_s24 + $0x80] sm:$0x1] %v3217_v59 }
 0x4f3   : > { %v3061_v51 = vpop.permute.xlu0 %3060  ;;  %v3065_v24 = vpop.permute.xlu1 %3064 }
 0x4f4   : > { %v3220_v58 = vsel %vm5041_vm14, %v3061_v51, %v3623_v53  ;;  %v3224_v49 = vsel %vm5222_vm0, %v3065_v24, %v3626_v13 }
 0x4f5   : > { %3624 = vst [vmem:[%s3871_s24 + $0x84] sm:$0xf] %v3220_v58  ;;  %3627 = vst [vmem:[%s3871_s24 + $0x8c] sm:$0x1] %v3224_v49 }
 0x4f7   : > { %v3067_v3 = vpop.permute.xlu0 %3066  ;;  %v3071_v44 = vpop.permute.xlu1 %3070 }
 0x4f8   : > { %v3227_v57 = vsel %vm5041_vm14, %v3067_v3, %v3628_v19  ;;  %v3231_v14 = vsel %vm5222_vm0, %v3071_v44, %v3631_v8 }
 0x4f9   : > { %3629 = vst [vmem:[%s3871_s24 + $0x90] sm:$0xf] %v3227_v57  ;;  %3632 = vst [vmem:[%s3871_s24 + $0x98] sm:$0x1] %v3231_v14 }
 0x4fb   : > { %v3073_v1 = vpop.permute.xlu0 %3072  ;;  %v3077_v38 = vpop.permute.xlu1 %3076 }
 0x4fc   : > { %v3234_v20 = vsel %vm5041_vm14, %v3073_v1, %v3633_v0  ;;  %v3238_v55 = vsel %vm5222_vm0, %v3077_v38, %v3636_v23 }
 0x4fd   : > { %3634 = vst [vmem:[%s3871_s24 + $0x9c] sm:$0xf] %v3234_v20  ;;  %3637 = vst [vmem:[%s3871_s24 + $0xa4] sm:$0x1] %v3238_v55 }
 0x4ff   : > { %v3079_v50 = vpop.permute.xlu0 %3078  ;;  %v3083_v61 = vpop.permute.xlu1 %3082 }
 0x500   : > { %v3241_v11 = vsel %vm5041_vm14, %v3079_v50, %v3638_v62  ;;  %v3245_v29 = vsel %vm5222_vm0, %v3083_v61, %v3641_v10 }
 0x501   : > { %3639 = vst [vmem:[%s3871_s24 + $0xa8] sm:$0xf] %v3241_v11  ;;  %3642 = vst [vmem:[%s3871_s24 + $0xb0] sm:$0x1] %v3245_v29 }
 0x503   : > { %v3085_v42 = vpop.permute.xlu0 %3084 }
 0x504   : > { %v3248_v12 = vsel %vm5041_vm14, %v3085_v42, %v3643_v21 }
 0x505   : > { %3644 = vst [vmem:[%s3871_s24 + $0xb4] sm:$0xf] %v3248_v12 }
 0x507   : > { %v3091_v15 = vpop.permute.xlu0 %3090 }
 0x508   : > { %v3255_v35 = vsel %vm5041_vm14, %v3091_v15, %v3648_v56 }
 0x509   : > { %v3089_v48 = vpop.permute.xlu1 %3088  ;;  %3649 = vst [vmem:[%s3871_s24 + $0xc0] sm:$0xf] %v3255_v35 }
 0x50a   : > { %v3252_v46 = vsel %vm5222_vm0, %v3089_v48, %v3646_v22 }
 0x50b   : > { %3647 = vst [vmem:[%s3871_s24 + $0xbc] sm:$0x1] %v3252_v46  ;;  %v3051_v4 = vpop.permute.xlu0 %3050 }
 0x50c   : > { %3615 = vst.msk [vmem:[%s3871_s24 + $0x70] sm:$0xf] %vm3144_vm13, %v3051_v4 }
 0x50e   : > { %v3095_v60 = vpop.permute.xlu1 %3094 }
 0x50f   : > { %v3259_v43 = vsel %vm5222_vm0, %v3095_v60, %v3651_v26  ;;  %v3063_v16 = vpop.permute.xlu0 %3062 }
 0x510   : > { %3652 = vst [vmem:[%s3871_s24 + $0xc8] sm:$0x1] %v3259_v43  ;;  %3625 = vst.msk [vmem:[%s3871_s24 + $0x88] sm:$0xf] %vm3144_vm13, %v3063_v16 }
 0x512   : > { %v3057_v27 = vpop.permute.xlu1 %3056 }
 0x513   : > { %3620 = vst.msk [vmem:[%s3871_s24 + $0x7c] sm:$0xf] %vm3144_vm13, %v3057_v27  ;;  %v3075_v9 = vpop.permute.xlu0 %3074 }
 0x514   : > { %3635 = vst.msk [vmem:[%s3871_s24 + $0xa0] sm:$0xf] %vm3144_vm13, %v3075_v9 }
 0x516   : > { %v3069_v28 = vpop.permute.xlu1 %3068 }
 0x517   : > { %3630 = vst.msk [vmem:[%s3871_s24 + $0x94] sm:$0xf] %vm3144_vm13, %v3069_v28  ;;  %v3087_v18 = vpop.permute.xlu0 %3086 }
 0x518   : > { %3645 = vst.msk [vmem:[%s3871_s24 + $0xb8] sm:$0xf] %vm3144_vm13, %v3087_v18 }
 0x51a   : > { %v3081_v2 = vpop.permute.xlu1 %3080 }
 0x51b   : > { %3640 = vst.msk [vmem:[%s3871_s24 + $0xac] sm:$0xf] %vm3144_vm13, %v3081_v2 }
 0x51e   : > { %v3093_v6 = vpop.permute.xlu1 %3092 }
 0x51f   : > { %3650 = vst.msk [vmem:[%s3871_s24 + $0xc4] sm:$0xf] %vm3144_vm13, %v3093_v6 }
 0x520 PF: > { %s14_s15 = sadd.s32 1, %s3789_s15  }
 0x521   : > { %p11_p4 = scmp.ge.s32.totalorder %s14_s15, 4  }
 0x523   :  { %13 = sbr.rel (!%p11_p4) target bundleno = 1 (0x1), region = 71 }

</bundles_post_ra>
